<compile_context>
chip_gen: v7x
topology: tpu7x:2x2x1
jax: 0.10.0
libtpu: 0.0.40
codegen_flags: <defaults>
</compile_context>

<pallas_src>
import functools

import jax
import jax.numpy as jnp
from jax import lax
from jax.experimental import pallas as pl
from jax.experimental.pallas import tpu as pltpu


# ------------------------------ fused kernel ------------------------------- #

def _fused_encoder_kernel(*refs, B, L, V, E, layer_cfg):
    """Whole EncoderCNN forward in one kernel invocation.

    refs layout:
      inputs : ids   [B*L, 1] int32
               embed [V, E]   f32
               per layer i: w_taps [K, C_in, C_out], bias [1, C_out],
                            gamma [1, C_out], beta [1, C_out]
      outputs: out [B, C_last, L_last],  x_embed [B, E, L]
      scratch: per layer i, channels-last layer input [B*L_in, C_in] (VMEM)
    """
    n_layers = len(layer_cfg)
    n_in = 2 + 4 * n_layers
    ids_ref, embed_ref = refs[0], refs[1]
    layer_params = [refs[2 + 4 * i: 2 + 4 * (i + 1)] for i in range(n_layers)]
    out_ref, xemb_ref = refs[n_in], refs[n_in + 1]
    act_refs = refs[n_in + 2:]

    # ---- embed.weight = F.normalize(embed.weight, p=2, dim=1) -------------- #
    w = embed_ref[...]
    norm = jnp.sqrt(jnp.sum(w * w, axis=1, keepdims=True))
    w_norm = w / jnp.maximum(norm, 1e-12)                  # F.normalize eps

    # ---- embedding lookup: one-hot @ normalized table (MXU, no gather) ----- #
    BL = B * L
    vocab_iota = lax.broadcasted_iota(jnp.int32, (BL, V), 1)
    onehot = (ids_ref[...] == vocab_iota).astype(jnp.float32)   # [BL, V]
    emb = jnp.dot(onehot, w_norm, preferred_element_type=jnp.float32)  # [BL, E]

    act_refs[0][...] = emb                                  # channels-last input
    for b in range(B):
        # x_embed is returned in the PyTorch [B, E, L] layout.
        xemb_ref[b] = emb[b * L:(b + 1) * L, :].T

    # ---- Conv1d + BatchNorm1d (+ ReLU) stack, fully VMEM-resident ---------- #
    for li, (K, stride, c_in, c_out, l_in, l_out, relu) in enumerate(layer_cfg):
        w_ref, b_ref, g_ref, beta_ref = layer_params[li]
        in_ref = act_refs[li]
        is_last = li == n_layers - 1

        conv_bs = []
        tot = jnp.zeros((1, c_out), jnp.float32)
        for b in range(B):
            acc = jnp.zeros((l_out, c_out), jnp.float32)
            base = b * l_in
            for k in range(K):
                # K shifted (strided) slices of the channels-last activation,
                # each feeding one small MXU matmul (f32 accumulation).
                if stride == 1:
                    xk = in_ref[pl.ds(base + k, l_out), :]
                else:
                    xk = in_ref[pl.ds(base + k, l_out, stride=stride), :]
                acc = acc + jnp.dot(xk, w_ref[k],
                                    preferred_element_type=jnp.float32)
            acc = acc + b_ref[...]
            conv_bs.append(acc)
            tot = tot + jnp.sum(acc, axis=0, keepdims=True)

        # BatchNorm1d, training-mode batch statistics (biased variance).
        inv_n = 1.0 / float(B * l_out)
        mean = tot * inv_n
        csq = jnp.zeros((1, c_out), jnp.float32)
        for b in range(B):
            d = conv_bs[b] - mean
            csq = csq + jnp.sum(d * d, axis=0, keepdims=True)   # two-pass var
        var = csq * inv_n
        scale = g_ref[...] * lax.rsqrt(var + 1e-5)              # EUP rsqrt
        shift = beta_ref[...] - mean * scale

        for b in range(B):
            y = conv_bs[b] * scale + shift
            if relu:
                y = jnp.maximum(y, 0.0)
            if is_last:
                out_ref[b] = y.T                     # PyTorch [B, C_out, L_out]
            else:
                act_refs[li + 1][pl.ds(b * l_out, l_out), :] = y


# ------------------------------- model glue -------------------------------- #

def encoder_cnn_forward(params, x_ids, stride):
    embed = params["embed"]
    V, E = embed.shape
    B, L = x_ids.shape
    layers = params["layers"]
    n_layers = len(layers)

    # Static per-layer configuration + flattened kernel parameters.
    layer_cfg = []
    flat_params = []
    l_in, c_in = L, E
    for i, (W, bias, gamma, beta) in enumerate(layers):
        c_out, c_in_w, K = W.shape
        s = 1 if i == n_layers - 1 else stride      # final Conv1d uses stride=1
        l_out = (l_in - K) // s + 1
        relu = i != n_layers - 1
        layer_cfg.append((K, s, c_in_w, c_out, l_in, l_out, relu))
        flat_params += [
            jnp.transpose(W, (2, 1, 0)),            # [K, C_in, C_out] tap-major
            bias.reshape(1, c_out),
            gamma.reshape(1, c_out),
            beta.reshape(1, c_out),
        ]
        l_in, c_in = l_out, c_out

    c_last, l_last = layer_cfg[-1][3], layer_cfg[-1][5]
    ids2 = x_ids.reshape(B * L, 1).astype(jnp.int32)

    kernel = functools.partial(
        _fused_encoder_kernel, B=B, L=L, V=V, E=E, layer_cfg=tuple(layer_cfg))

    def vmem_spec():
        return pl.BlockSpec(memory_space=pltpu.MemorySpace.VMEM)

    n_inputs = 2 + len(flat_params)
    scratch_shapes = [
        pltpu.VMEM((B * cfg[4], cfg[2]), jnp.float32) for cfg in layer_cfg
    ]

    out, x_embed = pl.pallas_call(
        kernel,
        out_shape=(jax.ShapeDtypeStruct((B, c_last, l_last), jnp.float32),
                   jax.ShapeDtypeStruct((B, E, L), jnp.float32)),
        in_specs=[vmem_spec() for _ in range(n_inputs)],
        out_specs=(vmem_spec(), vmem_spec()),
        scratch_shapes=scratch_shapes,
    )(ids2, embed, *flat_params)
    return out, x_embed


def init_params(key, vocab_size, embed_size, filter_size, filter_nums,
                final_filter_size):
    keys = jax.random.split(key, 1 + 2 * len(filter_nums))
    params = {"embed": jax.random.normal(
        keys[0], (vocab_size, embed_size), jnp.float32)}
    in_chs = [embed_size] + list(filter_nums[:-1])
    ksizes = [filter_size] * (len(filter_nums) - 1) + [final_filter_size]
    layers = []
    for i, (cin, cout, k) in enumerate(zip(in_chs, filter_nums, ksizes)):
        kw, kb = keys[1 + 2 * i], keys[2 + 2 * i]
        std = (2.0 / (cin * k + cout * k)) ** 0.5   # xavier_normal
        W = std * jax.random.normal(kw, (cout, cin, k), jnp.float32)
        bound = 1.0 / ((cin * k) ** 0.5)
        bias = jax.random.uniform(kb, (cout,), jnp.float32, -bound, bound)
        gamma = jnp.ones((cout,), jnp.float32)
        beta = jnp.zeros((cout,), jnp.float32)
        layers.append((W, bias, gamma, beta))
    params["layers"] = layers
    return params


# ---------------------------------- main ----------------------------------- #

if __name__ == "__main__":
    vocab_size, embed_size = 50, 16
    filter_size, stride = 3, 2
    filter_nums = [16, 24, 32]
    final_filter_size = 2
    B, L = 2, 32

    key = jax.random.PRNGKey(0)
    kp, kx = jax.random.split(key)
    params = init_params(kp, vocab_size, embed_size, filter_size, filter_nums,
                         final_filter_size)
    x_ids = jax.random.randint(kx, (B, L), 0, vocab_size, dtype=jnp.int32)

    forward = jax.jit(encoder_cnn_forward, static_argnums=(2,))
    out, x_embed = forward(params, x_ids, stride)
    jax.block_until_ready((out, x_embed))

    # L: 32 -> 15 (k3,s2) -> 7 (k3,s2) -> 6 (k2,s1)
    assert out.shape == (B, filter_nums[-1], 6), out.shape
    assert x_embed.shape == (B, embed_size, L), x_embed.shape
    assert bool(jnp.all(jnp.isfinite(out))) and bool(jnp.all(jnp.isfinite(x_embed)))
    print("KERNEL_OK")
</pallas_src>

<mosaic_0001>
module attributes {stable_mosaic.version = 11 : i64} {
  func.func @_fused_encoder_kernel(%arg0: memref<64x1xi32, #tpu.memory_space<vmem>>, %arg1: memref<50x16xf32, #tpu.memory_space<vmem>>, %arg2: memref<3x16x16xf32, #tpu.memory_space<vmem>>, %arg3: memref<1x16xf32, #tpu.memory_space<vmem>>, %arg4: memref<1x16xf32, #tpu.memory_space<vmem>>, %arg5: memref<1x16xf32, #tpu.memory_space<vmem>>, %arg6: memref<3x16x24xf32, #tpu.memory_space<vmem>>, %arg7: memref<1x24xf32, #tpu.memory_space<vmem>>, %arg8: memref<1x24xf32, #tpu.memory_space<vmem>>, %arg9: memref<1x24xf32, #tpu.memory_space<vmem>>, %arg10: memref<2x24x32xf32, #tpu.memory_space<vmem>>, %arg11: memref<1x32xf32, #tpu.memory_space<vmem>>, %arg12: memref<1x32xf32, #tpu.memory_space<vmem>>, %arg13: memref<1x32xf32, #tpu.memory_space<vmem>>, %arg14: memref<2x32x6xf32, #tpu.memory_space<vmem>>, %arg15: memref<2x16x32xf32, #tpu.memory_space<vmem>>, %arg16: memref<64x16xf32, #tpu.memory_space<vmem>>, %arg17: memref<30x16xf32, #tpu.memory_space<vmem>>, %arg18: memref<14x24xf32, #tpu.memory_space<vmem>>) attributes {dimension_semantics = [], scalar_prefetch = 0 : i64, scratch_operands = 3 : i64, tpu.core_type = #tpu.core_type<tc>} {
    %c0 = arith.constant 0 : index
    %c0_0 = arith.constant 0 : index
    %0 = vector.load %arg1[%c0, %c0_0] : memref<50x16xf32, #tpu.memory_space<vmem>>, vector<50x16xf32>
    %1 = arith.mulf %0, %0 : vector<50x16xf32>
    %cst = arith.constant dense<0.000000e+00> : vector<50xf32>
    %2 = vector.multi_reduction <add>, %1, %cst [1] : vector<50x16xf32> to vector<50xf32>
    %3 = vector.shape_cast %2 : vector<50xf32> to vector<50x1xf32>
    %4 = math.sqrt %3 : vector<50x1xf32>
    %cst_1 = arith.constant 9.99999996E-13 : f32
    %5 = vector.broadcast %cst_1 : f32 to vector<50x1xf32>
    %6 = arith.maximumf %4, %5 : vector<50x1xf32>
    %7 = vector.broadcast %6 : vector<50x1xf32> to vector<50x16xf32>
    %8 = arith.divf %0, %7 : vector<50x16xf32>
    %9 = tpu.iota {dimensions = array<i32: 1>} : vector<64x50xi32>
    %c0_2 = arith.constant 0 : index
    %c0_3 = arith.constant 0 : index
    %10 = vector.load %arg0[%c0_2, %c0_3] : memref<64x1xi32, #tpu.memory_space<vmem>>, vector<64x1xi32>
    %11 = vector.broadcast %10 : vector<64x1xi32> to vector<64x50xi32>
    %12 = arith.cmpi eq, %11, %9 : vector<64x50xi32>
    %13 = arith.extui %12 : vector<64x50xi1> to vector<64x50xi32>
    %14 = arith.sitofp %13 : vector<64x50xi32> to vector<64x50xf32>
    %cst_4 = arith.constant dense<0.000000e+00> : vector<64x16xf32>
    %15 = tpu.matmul %14, %8, %cst_4 {dimension_numbers = #tpu.dot_dimension_numbers<[1], [0], [0], [1], [0, 0, 1, 1], [], []>} : vector<64x50xf32>, vector<50x16xf32>, vector<64x16xf32> -> vector<64x16xf32>
    %c0_5 = arith.constant 0 : index
    %c0_6 = arith.constant 0 : index
    %16 = vector.load %arg16[%c0_5, %c0_6] : memref<64x16xf32, #tpu.memory_space<vmem>>, vector<64x16xf32>
    tpu.vector_store %arg16[%c0_5, %c0_6], %15 {strides = array<i32>} : memref<64x16xf32, #tpu.memory_space<vmem>>, vector<64x16xf32>,
    %17 = vector.extract_strided_slice %15 {offsets = [0, 0], sizes = [32, 16], strides = [1, 1]} : vector<64x16xf32> to vector<32x16xf32>
    %18 = tpu.transpose %17, [1, 0] : vector<32x16xf32> -> vector<16x32xf32>
    %c0_7 = arith.constant 0 : index
    %c0_8 = arith.constant 0 : index
    %c0_9 = arith.constant 0 : index
    %19 = vector.load %arg15[%c0_7, %c0_8, %c0_9] : memref<2x16x32xf32, #tpu.memory_space<vmem>>, vector<1x16x32xf32>
    %20 = vector.shape_cast %19 : vector<1x16x32xf32> to vector<16x32xf32>
    %21 = vector.shape_cast %18 : vector<16x32xf32> to vector<1x16x32xf32>
    tpu.vector_store %arg15[%c0_7, %c0_8, %c0_9], %21 {strides = array<i32>} : memref<2x16x32xf32, #tpu.memory_space<vmem>>, vector<1x16x32xf32>,
    %22 = vector.extract_strided_slice %15 {offsets = [32, 0], sizes = [32, 16], strides = [1, 1]} : vector<64x16xf32> to vector<32x16xf32>
    %23 = tpu.transpose %22, [1, 0] : vector<32x16xf32> -> vector<16x32xf32>
    %c1 = arith.constant 1 : index
    %c0_10 = arith.constant 0 : index
    %c0_11 = arith.constant 0 : index
    %24 = vector.load %arg15[%c1, %c0_10, %c0_11] : memref<2x16x32xf32, #tpu.memory_space<vmem>>, vector<1x16x32xf32>
    %25 = vector.shape_cast %24 : vector<1x16x32xf32> to vector<16x32xf32>
    %26 = vector.shape_cast %23 : vector<16x32xf32> to vector<1x16x32xf32>
    tpu.vector_store %arg15[%c1, %c0_10, %c0_11], %26 {strides = array<i32>} : memref<2x16x32xf32, #tpu.memory_space<vmem>>, vector<1x16x32xf32>,
    %cst_12 = arith.constant 0.000000e+00 : f32
    %27 = vector.broadcast %cst_12 : f32 to vector<1x16xf32>
    %cst_13 = arith.constant 0.000000e+00 : f32
    %28 = vector.broadcast %cst_13 : f32 to vector<15x16xf32>
    %c0_14 = arith.constant 0 : index
    %c0_15 = arith.constant 0 : index
    %29 = tpu.strided_load %arg16[%c0_14, %c0_15] {strides = array<i32: 2, 1>} : memref<64x16xf32, #tpu.memory_space<vmem>>, vector<15x16xf32>
    %c0_16 = arith.constant 0 : index
    %c0_17 = arith.constant 0 : index
    %c0_18 = arith.constant 0 : index
    %30 = vector.load %arg2[%c0_16, %c0_17, %c0_18] : memref<3x16x16xf32, #tpu.memory_space<vmem>>, vector<1x16x16xf32>
    %31 = vector.shape_cast %30 : vector<1x16x16xf32> to vector<16x16xf32>
    %cst_19 = arith.constant dense<0.000000e+00> : vector<15x16xf32>
    %32 = tpu.matmul %29, %31, %cst_19 {dimension_numbers = #tpu.dot_dimension_numbers<[1], [0], [0], [1], [0, 0, 1, 1], [], []>} : vector<15x16xf32>, vector<16x16xf32>, vector<15x16xf32> -> vector<15x16xf32>
    %33 = arith.addf %28, %32 : vector<15x16xf32>
    %c1_20 = arith.constant 1 : index
    %c0_21 = arith.constant 0 : index
    %34 = tpu.strided_load %arg16[%c1_20, %c0_21] {strides = array<i32: 2, 1>} : memref<64x16xf32, #tpu.memory_space<vmem>>, vector<15x16xf32>
    %c1_22 = arith.constant 1 : index
    %c0_23 = arith.constant 0 : index
    %c0_24 = arith.constant 0 : index
    %35 = vector.load %arg2[%c1_22, %c0_23, %c0_24] : memref<3x16x16xf32, #tpu.memory_space<vmem>>, vector<1x16x16xf32>
    %36 = vector.shape_cast %35 : vector<1x16x16xf32> to vector<16x16xf32>
    %cst_25 = arith.constant dense<0.000000e+00> : vector<15x16xf32>
    %37 = tpu.matmul %34, %36, %cst_25 {dimension_numbers = #tpu.dot_dimension_numbers<[1], [0], [0], [1], [0, 0, 1, 1], [], []>} : vector<15x16xf32>, vector<16x16xf32>, vector<15x16xf32> -> vector<15x16xf32>
    %38 = arith.addf %33, %37 : vector<15x16xf32>
    %c2 = arith.constant 2 : index
    %c0_26 = arith.constant 0 : index
    %39 = tpu.strided_load %arg16[%c2, %c0_26] {strides = array<i32: 2, 1>} : memref<64x16xf32, #tpu.memory_space<vmem>>, vector<15x16xf32>
    %c2_27 = arith.constant 2 : index
    %c0_28 = arith.constant 0 : index
    %c0_29 = arith.constant 0 : index
    %40 = vector.load %arg2[%c2_27, %c0_28, %c0_29] : memref<3x16x16xf32, #tpu.memory_space<vmem>>, vector<1x16x16xf32>
    %41 = vector.shape_cast %40 : vector<1x16x16xf32> to vector<16x16xf32>
    %cst_30 = arith.constant dense<0.000000e+00> : vector<15x16xf32>
    %42 = tpu.matmul %39, %41, %cst_30 {dimension_numbers = #tpu.dot_dimension_numbers<[1], [0], [0], [1], [0, 0, 1, 1], [], []>} : vector<15x16xf32>, vector<16x16xf32>, vector<15x16xf32> -> vector<15x16xf32>
    %43 = arith.addf %38, %42 : vector<15x16xf32>
    %c0_31 = arith.constant 0 : index
    %c0_32 = arith.constant 0 : index
    %44 = vector.load %arg3[%c0_31, %c0_32] : memref<1x16xf32, #tpu.memory_space<vmem>>, vector<1x16xf32>
    %45 = vector.broadcast %44 : vector<1x16xf32> to vector<15x16xf32>
    %46 = arith.addf %43, %45 : vector<15x16xf32>
    %cst_33 = arith.constant dense<0.000000e+00> : vector<16xf32>
    %47 = vector.multi_reduction <add>, %46, %cst_33 [0] : vector<15x16xf32> to vector<16xf32>
    %48 = vector.shape_cast %47 : vector<16xf32> to vector<1x16xf32>
    %49 = arith.addf %27, %48 : vector<1x16xf32>
    %cst_34 = arith.constant 0.000000e+00 : f32
    %50 = vector.broadcast %cst_34 : f32 to vector<15x16xf32>
    %c32 = arith.constant 32 : index
    %c0_35 = arith.constant 0 : index
    %51 = tpu.strided_load %arg16[%c32, %c0_35] {strides = array<i32: 2, 1>} : memref<64x16xf32, #tpu.memory_space<vmem>>, vector<15x16xf32>
    %c0_36 = arith.constant 0 : index
    %c0_37 = arith.constant 0 : index
    %c0_38 = arith.constant 0 : index
    %52 = vector.load %arg2[%c0_36, %c0_37, %c0_38] : memref<3x16x16xf32, #tpu.memory_space<vmem>>, vector<1x16x16xf32>
    %53 = vector.shape_cast %52 : vector<1x16x16xf32> to vector<16x16xf32>
    %cst_39 = arith.constant dense<0.000000e+00> : vector<15x16xf32>
    %54 = tpu.matmul %51, %53, %cst_39 {dimension_numbers = #tpu.dot_dimension_numbers<[1], [0], [0], [1], [0, 0, 1, 1], [], []>} : vector<15x16xf32>, vector<16x16xf32>, vector<15x16xf32> -> vector<15x16xf32>
    %55 = arith.addf %50, %54 : vector<15x16xf32>
    %c33 = arith.constant 33 : index
    %c0_40 = arith.constant 0 : index
    %56 = tpu.strided_load %arg16[%c33, %c0_40] {strides = array<i32: 2, 1>} : memref<64x16xf32, #tpu.memory_space<vmem>>, vector<15x16xf32>
    %c1_41 = arith.constant 1 : index
    %c0_42 = arith.constant 0 : index
    %c0_43 = arith.constant 0 : index
    %57 = vector.load %arg2[%c1_41, %c0_42, %c0_43] : memref<3x16x16xf32, #tpu.memory_space<vmem>>, vector<1x16x16xf32>
    %58 = vector.shape_cast %57 : vector<1x16x16xf32> to vector<16x16xf32>
    %cst_44 = arith.constant dense<0.000000e+00> : vector<15x16xf32>
    %59 = tpu.matmul %56, %58, %cst_44 {dimension_numbers = #tpu.dot_dimension_numbers<[1], [0], [0], [1], [0, 0, 1, 1], [], []>} : vector<15x16xf32>, vector<16x16xf32>, vector<15x16xf32> -> vector<15x16xf32>
    %60 = arith.addf %55, %59 : vector<15x16xf32>
    %c34 = arith.constant 34 : index
    %c0_45 = arith.constant 0 : index
    %61 = tpu.strided_load %arg16[%c34, %c0_45] {strides = array<i32: 2, 1>} : memref<64x16xf32, #tpu.memory_space<vmem>>, vector<15x16xf32>
    %c2_46 = arith.constant 2 : index
    %c0_47 = arith.constant 0 : index
    %c0_48 = arith.constant 0 : index
    %62 = vector.load %arg2[%c2_46, %c0_47, %c0_48] : memref<3x16x16xf32, #tpu.memory_space<vmem>>, vector<1x16x16xf32>
    %63 = vector.shape_cast %62 : vector<1x16x16xf32> to vector<16x16xf32>
    %cst_49 = arith.constant dense<0.000000e+00> : vector<15x16xf32>
    %64 = tpu.matmul %61, %63, %cst_49 {dimension_numbers = #tpu.dot_dimension_numbers<[1], [0], [0], [1], [0, 0, 1, 1], [], []>} : vector<15x16xf32>, vector<16x16xf32>, vector<15x16xf32> -> vector<15x16xf32>
    %65 = arith.addf %60, %64 : vector<15x16xf32>
    %c0_50 = arith.constant 0 : index
    %c0_51 = arith.constant 0 : index
    %66 = vector.load %arg3[%c0_50, %c0_51] : memref<1x16xf32, #tpu.memory_space<vmem>>, vector<1x16xf32>
    %67 = vector.broadcast %66 : vector<1x16xf32> to vector<15x16xf32>
    %68 = arith.addf %65, %67 : vector<15x16xf32>
    %cst_52 = arith.constant dense<0.000000e+00> : vector<16xf32>
    %69 = vector.multi_reduction <add>, %68, %cst_52 [0] : vector<15x16xf32> to vector<16xf32>
    %70 = vector.shape_cast %69 : vector<16xf32> to vector<1x16xf32>
    %71 = arith.addf %49, %70 : vector<1x16xf32>
    %cst_53 = arith.constant 0.0333333351 : f32
    %72 = vector.broadcast %cst_53 : f32 to vector<1x16xf32>
    %73 = arith.mulf %71, %72 : vector<1x16xf32>
    %cst_54 = arith.constant 0.000000e+00 : f32
    %74 = vector.broadcast %cst_54 : f32 to vector<1x16xf32>
    %75 = vector.broadcast %73 : vector<1x16xf32> to vector<15x16xf32>
    %76 = arith.subf %46, %75 : vector<15x16xf32>
    %77 = arith.mulf %76, %76 : vector<15x16xf32>
    %cst_55 = arith.constant dense<0.000000e+00> : vector<16xf32>
    %78 = vector.multi_reduction <add>, %77, %cst_55 [0] : vector<15x16xf32> to vector<16xf32>
    %79 = vector.shape_cast %78 : vector<16xf32> to vector<1x16xf32>
    %80 = arith.addf %74, %79 : vector<1x16xf32>
    %81 = vector.broadcast %73 : vector<1x16xf32> to vector<15x16xf32>
    %82 = arith.subf %68, %81 : vector<15x16xf32>
    %83 = arith.mulf %82, %82 : vector<15x16xf32>
    %cst_56 = arith.constant dense<0.000000e+00> : vector<16xf32>
    %84 = vector.multi_reduction <add>, %83, %cst_56 [0] : vector<15x16xf32> to vector<16xf32>
    %85 = vector.shape_cast %84 : vector<16xf32> to vector<1x16xf32>
    %86 = arith.addf %80, %85 : vector<1x16xf32>
    %cst_57 = arith.constant 0.0333333351 : f32
    %87 = vector.broadcast %cst_57 : f32 to vector<1x16xf32>
    %88 = arith.mulf %86, %87 : vector<1x16xf32>
    %c0_58 = arith.constant 0 : index
    %c0_59 = arith.constant 0 : index
    %89 = vector.load %arg4[%c0_58, %c0_59] : memref<1x16xf32, #tpu.memory_space<vmem>>, vector<1x16xf32>
    %cst_60 = arith.constant 9.99999974E-6 : f32
    %90 = vector.broadcast %cst_60 : f32 to vector<1x16xf32>
    %91 = arith.addf %88, %90 : vector<1x16xf32>
    %92 = math.rsqrt %91 : vector<1x16xf32>
    %93 = arith.mulf %89, %92 : vector<1x16xf32>
    %c0_61 = arith.constant 0 : index
    %c0_62 = arith.constant 0 : index
    %94 = vector.load %arg5[%c0_61, %c0_62] : memref<1x16xf32, #tpu.memory_space<vmem>>, vector<1x16xf32>
    %95 = arith.mulf %73, %93 : vector<1x16xf32>
    %96 = arith.subf %94, %95 : vector<1x16xf32>
    %97 = vector.broadcast %93 : vector<1x16xf32> to vector<15x16xf32>
    %98 = arith.mulf %46, %97 : vector<15x16xf32>
    %99 = vector.broadcast %96 : vector<1x16xf32> to vector<15x16xf32>
    %100 = arith.addf %98, %99 : vector<15x16xf32>
    %cst_63 = arith.constant 0.000000e+00 : f32
    %101 = vector.broadcast %cst_63 : f32 to vector<15x16xf32>
    %102 = arith.maximumf %100, %101 : vector<15x16xf32>
    %c0_64 = arith.constant 0 : index
    %c0_65 = arith.constant 0 : index
    %103 = vector.load %arg17[%c0_64, %c0_65] : memref<30x16xf32, #tpu.memory_space<vmem>>, vector<15x16xf32>
    tpu.vector_store %arg17[%c0_64, %c0_65], %102 {strides = array<i32>} : memref<30x16xf32, #tpu.memory_space<vmem>>, vector<15x16xf32>,
    %104 = vector.broadcast %93 : vector<1x16xf32> to vector<15x16xf32>
    %105 = arith.mulf %68, %104 : vector<15x16xf32>
    %106 = vector.broadcast %96 : vector<1x16xf32> to vector<15x16xf32>
    %107 = arith.addf %105, %106 : vector<15x16xf32>
    %cst_66 = arith.constant 0.000000e+00 : f32
    %108 = vector.broadcast %cst_66 : f32 to vector<15x16xf32>
    %109 = arith.maximumf %107, %108 : vector<15x16xf32>
    %c15 = arith.constant 15 : index
    %c0_67 = arith.constant 0 : index
    %110 = vector.load %arg17[%c15, %c0_67] : memref<30x16xf32, #tpu.memory_space<vmem>>, vector<15x16xf32>
    tpu.vector_store %arg17[%c15, %c0_67], %109 {strides = array<i32>} : memref<30x16xf32, #tpu.memory_space<vmem>>, vector<15x16xf32>,
    %cst_68 = arith.constant 0.000000e+00 : f32
    %111 = vector.broadcast %cst_68 : f32 to vector<1x24xf32>
    %cst_69 = arith.constant 0.000000e+00 : f32
    %112 = vector.broadcast %cst_69 : f32 to vector<7x24xf32>
    %c0_70 = arith.constant 0 : index
    %c0_71 = arith.constant 0 : index
    %113 = tpu.strided_load %arg17[%c0_70, %c0_71] {strides = array<i32: 2, 1>} : memref<30x16xf32, #tpu.memory_space<vmem>>, vector<7x16xf32>
    %c0_72 = arith.constant 0 : index
    %c0_73 = arith.constant 0 : index
    %c0_74 = arith.constant 0 : index
    %114 = vector.load %arg6[%c0_72, %c0_73, %c0_74] : memref<3x16x24xf32, #tpu.memory_space<vmem>>, vector<1x16x24xf32>
    %115 = vector.shape_cast %114 : vector<1x16x24xf32> to vector<16x24xf32>
    %cst_75 = arith.constant dense<0.000000e+00> : vector<7x24xf32>
    %116 = tpu.matmul %113, %115, %cst_75 {dimension_numbers = #tpu.dot_dimension_numbers<[1], [0], [0], [1], [0, 0, 1, 1], [], []>} : vector<7x16xf32>, vector<16x24xf32>, vector<7x24xf32> -> vector<7x24xf32>
    %117 = arith.addf %112, %116 : vector<7x24xf32>
    %c1_76 = arith.constant 1 : index
    %c0_77 = arith.constant 0 : index
    %118 = tpu.strided_load %arg17[%c1_76, %c0_77] {strides = array<i32: 2, 1>} : memref<30x16xf32, #tpu.memory_space<vmem>>, vector<7x16xf32>
    %c1_78 = arith.constant 1 : index
    %c0_79 = arith.constant 0 : index
    %c0_80 = arith.constant 0 : index
    %119 = vector.load %arg6[%c1_78, %c0_79, %c0_80] : memref<3x16x24xf32, #tpu.memory_space<vmem>>, vector<1x16x24xf32>
    %120 = vector.shape_cast %119 : vector<1x16x24xf32> to vector<16x24xf32>
    %cst_81 = arith.constant dense<0.000000e+00> : vector<7x24xf32>
    %121 = tpu.matmul %118, %120, %cst_81 {dimension_numbers = #tpu.dot_dimension_numbers<[1], [0], [0], [1], [0, 0, 1, 1], [], []>} : vector<7x16xf32>, vector<16x24xf32>, vector<7x24xf32> -> vector<7x24xf32>
    %122 = arith.addf %117, %121 : vector<7x24xf32>
    %c2_82 = arith.constant 2 : index
    %c0_83 = arith.constant 0 : index
    %123 = tpu.strided_load %arg17[%c2_82, %c0_83] {strides = array<i32: 2, 1>} : memref<30x16xf32, #tpu.memory_space<vmem>>, vector<7x16xf32>
    %c2_84 = arith.constant 2 : index
    %c0_85 = arith.constant 0 : index
    %c0_86 = arith.constant 0 : index
    %124 = vector.load %arg6[%c2_84, %c0_85, %c0_86] : memref<3x16x24xf32, #tpu.memory_space<vmem>>, vector<1x16x24xf32>
    %125 = vector.shape_cast %124 : vector<1x16x24xf32> to vector<16x24xf32>
    %cst_87 = arith.constant dense<0.000000e+00> : vector<7x24xf32>
    %126 = tpu.matmul %123, %125, %cst_87 {dimension_numbers = #tpu.dot_dimension_numbers<[1], [0], [0], [1], [0, 0, 1, 1], [], []>} : vector<7x16xf32>, vector<16x24xf32>, vector<7x24xf32> -> vector<7x24xf32>
    %127 = arith.addf %122, %126 : vector<7x24xf32>
    %c0_88 = arith.constant 0 : index
    %c0_89 = arith.constant 0 : index
    %128 = vector.load %arg7[%c0_88, %c0_89] : memref<1x24xf32, #tpu.memory_space<vmem>>, vector<1x24xf32>
    %129 = vector.broadcast %128 : vector<1x24xf32> to vector<7x24xf32>
    %130 = arith.addf %127, %129 : vector<7x24xf32>
    %cst_90 = arith.constant dense<0.000000e+00> : vector<24xf32>
    %131 = vector.multi_reduction <add>, %130, %cst_90 [0] : vector<7x24xf32> to vector<24xf32>
    %132 = vector.shape_cast %131 : vector<24xf32> to vector<1x24xf32>
    %133 = arith.addf %111, %132 : vector<1x24xf32>
    %cst_91 = arith.constant 0.000000e+00 : f32
    %134 = vector.broadcast %cst_91 : f32 to vector<7x24xf32>
    %c15_92 = arith.constant 15 : index
    %c0_93 = arith.constant 0 : index
    %135 = tpu.strided_load %arg17[%c15_92, %c0_93] {strides = array<i32: 2, 1>} : memref<30x16xf32, #tpu.memory_space<vmem>>, vector<7x16xf32>
    %c0_94 = arith.constant 0 : index
    %c0_95 = arith.constant 0 : index
    %c0_96 = arith.constant 0 : index
    %136 = vector.load %arg6[%c0_94, %c0_95, %c0_96] : memref<3x16x24xf32, #tpu.memory_space<vmem>>, vector<1x16x24xf32>
    %137 = vector.shape_cast %136 : vector<1x16x24xf32> to vector<16x24xf32>
    %cst_97 = arith.constant dense<0.000000e+00> : vector<7x24xf32>
    %138 = tpu.matmul %135, %137, %cst_97 {dimension_numbers = #tpu.dot_dimension_numbers<[1], [0], [0], [1], [0, 0, 1, 1], [], []>} : vector<7x16xf32>, vector<16x24xf32>, vector<7x24xf32> -> vector<7x24xf32>
    %139 = arith.addf %134, %138 : vector<7x24xf32>
    %c16 = arith.constant 16 : index
    %c0_98 = arith.constant 0 : index
    %140 = tpu.strided_load %arg17[%c16, %c0_98] {strides = array<i32: 2, 1>} : memref<30x16xf32, #tpu.memory_space<vmem>>, vector<7x16xf32>
    %c1_99 = arith.constant 1 : index
    %c0_100 = arith.constant 0 : index
    %c0_101 = arith.constant 0 : index
    %141 = vector.load %arg6[%c1_99, %c0_100, %c0_101] : memref<3x16x24xf32, #tpu.memory_space<vmem>>, vector<1x16x24xf32>
    %142 = vector.shape_cast %141 : vector<1x16x24xf32> to vector<16x24xf32>
    %cst_102 = arith.constant dense<0.000000e+00> : vector<7x24xf32>
    %143 = tpu.matmul %140, %142, %cst_102 {dimension_numbers = #tpu.dot_dimension_numbers<[1], [0], [0], [1], [0, 0, 1, 1], [], []>} : vector<7x16xf32>, vector<16x24xf32>, vector<7x24xf32> -> vector<7x24xf32>
    %144 = arith.addf %139, %143 : vector<7x24xf32>
    %c17 = arith.constant 17 : index
    %c0_103 = arith.constant 0 : index
    %145 = tpu.strided_load %arg17[%c17, %c0_103] {strides = array<i32: 2, 1>} : memref<30x16xf32, #tpu.memory_space<vmem>>, vector<7x16xf32>
    %c2_104 = arith.constant 2 : index
    %c0_105 = arith.constant 0 : index
    %c0_106 = arith.constant 0 : index
    %146 = vector.load %arg6[%c2_104, %c0_105, %c0_106] : memref<3x16x24xf32, #tpu.memory_space<vmem>>, vector<1x16x24xf32>
    %147 = vector.shape_cast %146 : vector<1x16x24xf32> to vector<16x24xf32>
    %cst_107 = arith.constant dense<0.000000e+00> : vector<7x24xf32>
    %148 = tpu.matmul %145, %147, %cst_107 {dimension_numbers = #tpu.dot_dimension_numbers<[1], [0], [0], [1], [0, 0, 1, 1], [], []>} : vector<7x16xf32>, vector<16x24xf32>, vector<7x24xf32> -> vector<7x24xf32>
    %149 = arith.addf %144, %148 : vector<7x24xf32>
    %c0_108 = arith.constant 0 : index
    %c0_109 = arith.constant 0 : index
    %150 = vector.load %arg7[%c0_108, %c0_109] : memref<1x24xf32, #tpu.memory_space<vmem>>, vector<1x24xf32>
    %151 = vector.broadcast %150 : vector<1x24xf32> to vector<7x24xf32>
    %152 = arith.addf %149, %151 : vector<7x24xf32>
    %cst_110 = arith.constant dense<0.000000e+00> : vector<24xf32>
    %153 = vector.multi_reduction <add>, %152, %cst_110 [0] : vector<7x24xf32> to vector<24xf32>
    %154 = vector.shape_cast %153 : vector<24xf32> to vector<1x24xf32>
    %155 = arith.addf %133, %154 : vector<1x24xf32>
    %cst_111 = arith.constant 0.0714285746 : f32
    %156 = vector.broadcast %cst_111 : f32 to vector<1x24xf32>
    %157 = arith.mulf %155, %156 : vector<1x24xf32>
    %cst_112 = arith.constant 0.000000e+00 : f32
    %158 = vector.broadcast %cst_112 : f32 to vector<1x24xf32>
    %159 = vector.broadcast %157 : vector<1x24xf32> to vector<7x24xf32>
    %160 = arith.subf %130, %159 : vector<7x24xf32>
    %161 = arith.mulf %160, %160 : vector<7x24xf32>
    %cst_113 = arith.constant dense<0.000000e+00> : vector<24xf32>
    %162 = vector.multi_reduction <add>, %161, %cst_113 [0] : vector<7x24xf32> to vector<24xf32>
    %163 = vector.shape_cast %162 : vector<24xf32> to vector<1x24xf32>
    %164 = arith.addf %158, %163 : vector<1x24xf32>
    %165 = vector.broadcast %157 : vector<1x24xf32> to vector<7x24xf32>
    %166 = arith.subf %152, %165 : vector<7x24xf32>
    %167 = arith.mulf %166, %166 : vector<7x24xf32>
    %cst_114 = arith.constant dense<0.000000e+00> : vector<24xf32>
    %168 = vector.multi_reduction <add>, %167, %cst_114 [0] : vector<7x24xf32> to vector<24xf32>
    %169 = vector.shape_cast %168 : vector<24xf32> to vector<1x24xf32>
    %170 = arith.addf %164, %169 : vector<1x24xf32>
    %cst_115 = arith.constant 0.0714285746 : f32
    %171 = vector.broadcast %cst_115 : f32 to vector<1x24xf32>
    %172 = arith.mulf %170, %171 : vector<1x24xf32>
    %c0_116 = arith.constant 0 : index
    %c0_117 = arith.constant 0 : index
    %173 = vector.load %arg8[%c0_116, %c0_117] : memref<1x24xf32, #tpu.memory_space<vmem>>, vector<1x24xf32>
    %cst_118 = arith.constant 9.99999974E-6 : f32
    %174 = vector.broadcast %cst_118 : f32 to vector<1x24xf32>
    %175 = arith.addf %172, %174 : vector<1x24xf32>
    %176 = math.rsqrt %175 : vector<1x24xf32>
    %177 = arith.mulf %173, %176 : vector<1x24xf32>
    %c0_119 = arith.constant 0 : index
    %c0_120 = arith.constant 0 : index
    %178 = vector.load %arg9[%c0_119, %c0_120] : memref<1x24xf32, #tpu.memory_space<vmem>>, vector<1x24xf32>
    %179 = arith.mulf %157, %177 : vector<1x24xf32>
    %180 = arith.subf %178, %179 : vector<1x24xf32>
    %181 = vector.broadcast %177 : vector<1x24xf32> to vector<7x24xf32>
    %182 = arith.mulf %130, %181 : vector<7x24xf32>
    %183 = vector.broadcast %180 : vector<1x24xf32> to vector<7x24xf32>
    %184 = arith.addf %182, %183 : vector<7x24xf32>
    %cst_121 = arith.constant 0.000000e+00 : f32
    %185 = vector.broadcast %cst_121 : f32 to vector<7x24xf32>
    %186 = arith.maximumf %184, %185 : vector<7x24xf32>
    %c0_122 = arith.constant 0 : index
    %c0_123 = arith.constant 0 : index
    %187 = vector.load %arg18[%c0_122, %c0_123] : memref<14x24xf32, #tpu.memory_space<vmem>>, vector<7x24xf32>
    tpu.vector_store %arg18[%c0_122, %c0_123], %186 {strides = array<i32>} : memref<14x24xf32, #tpu.memory_space<vmem>>, vector<7x24xf32>,
    %188 = vector.broadcast %177 : vector<1x24xf32> to vector<7x24xf32>
    %189 = arith.mulf %152, %188 : vector<7x24xf32>
    %190 = vector.broadcast %180 : vector<1x24xf32> to vector<7x24xf32>
    %191 = arith.addf %189, %190 : vector<7x24xf32>
    %cst_124 = arith.constant 0.000000e+00 : f32
    %192 = vector.broadcast %cst_124 : f32 to vector<7x24xf32>
    %193 = arith.maximumf %191, %192 : vector<7x24xf32>
    %c7 = arith.constant 7 : index
    %c0_125 = arith.constant 0 : index
    %194 = vector.load %arg18[%c7, %c0_125] : memref<14x24xf32, #tpu.memory_space<vmem>>, vector<7x24xf32>
    tpu.vector_store %arg18[%c7, %c0_125], %193 {strides = array<i32>} : memref<14x24xf32, #tpu.memory_space<vmem>>, vector<7x24xf32>,
    %cst_126 = arith.constant 0.000000e+00 : f32
    %195 = vector.broadcast %cst_126 : f32 to vector<1x32xf32>
    %cst_127 = arith.constant 0.000000e+00 : f32
    %196 = vector.broadcast %cst_127 : f32 to vector<6x32xf32>
    %c0_128 = arith.constant 0 : index
    %c0_129 = arith.constant 0 : index
    %197 = vector.load %arg18[%c0_128, %c0_129] : memref<14x24xf32, #tpu.memory_space<vmem>>, vector<6x24xf32>
    %c0_130 = arith.constant 0 : index
    %c0_131 = arith.constant 0 : index
    %c0_132 = arith.constant 0 : index
    %198 = vector.load %arg10[%c0_130, %c0_131, %c0_132] : memref<2x24x32xf32, #tpu.memory_space<vmem>>, vector<1x24x32xf32>
    %199 = vector.shape_cast %198 : vector<1x24x32xf32> to vector<24x32xf32>
    %cst_133 = arith.constant dense<0.000000e+00> : vector<6x32xf32>
    %200 = tpu.matmul %197, %199, %cst_133 {dimension_numbers = #tpu.dot_dimension_numbers<[1], [0], [0], [1], [0, 0, 1, 1], [], []>} : vector<6x24xf32>, vector<24x32xf32>, vector<6x32xf32> -> vector<6x32xf32>
    %201 = arith.addf %196, %200 : vector<6x32xf32>
    %c1_134 = arith.constant 1 : index
    %c0_135 = arith.constant 0 : index
    %202 = vector.load %arg18[%c1_134, %c0_135] : memref<14x24xf32, #tpu.memory_space<vmem>>, vector<6x24xf32>
    %c1_136 = arith.constant 1 : index
    %c0_137 = arith.constant 0 : index
    %c0_138 = arith.constant 0 : index
    %203 = vector.load %arg10[%c1_136, %c0_137, %c0_138] : memref<2x24x32xf32, #tpu.memory_space<vmem>>, vector<1x24x32xf32>
    %204 = vector.shape_cast %203 : vector<1x24x32xf32> to vector<24x32xf32>
    %cst_139 = arith.constant dense<0.000000e+00> : vector<6x32xf32>
    %205 = tpu.matmul %202, %204, %cst_139 {dimension_numbers = #tpu.dot_dimension_numbers<[1], [0], [0], [1], [0, 0, 1, 1], [], []>} : vector<6x24xf32>, vector<24x32xf32>, vector<6x32xf32> -> vector<6x32xf32>
    %206 = arith.addf %201, %205 : vector<6x32xf32>
    %c0_140 = arith.constant 0 : index
    %c0_141 = arith.constant 0 : index
    %207 = vector.load %arg11[%c0_140, %c0_141] : memref<1x32xf32, #tpu.memory_space<vmem>>, vector<1x32xf32>
    %208 = vector.broadcast %207 : vector<1x32xf32> to vector<6x32xf32>
    %209 = arith.addf %206, %208 : vector<6x32xf32>
    %cst_142 = arith.constant dense<0.000000e+00> : vector<32xf32>
    %210 = vector.multi_reduction <add>, %209, %cst_142 [0] : vector<6x32xf32> to vector<32xf32>
    %211 = vector.shape_cast %210 : vector<32xf32> to vector<1x32xf32>
    %212 = arith.addf %195, %211 : vector<1x32xf32>
    %cst_143 = arith.constant 0.000000e+00 : f32
    %213 = vector.broadcast %cst_143 : f32 to vector<6x32xf32>
    %c7_144 = arith.constant 7 : index
    %c0_145 = arith.constant 0 : index
    %214 = vector.load %arg18[%c7_144, %c0_145] : memref<14x24xf32, #tpu.memory_space<vmem>>, vector<6x24xf32>
    %c0_146 = arith.constant 0 : index
    %c0_147 = arith.constant 0 : index
    %c0_148 = arith.constant 0 : index
    %215 = vector.load %arg10[%c0_146, %c0_147, %c0_148] : memref<2x24x32xf32, #tpu.memory_space<vmem>>, vector<1x24x32xf32>
    %216 = vector.shape_cast %215 : vector<1x24x32xf32> to vector<24x32xf32>
    %cst_149 = arith.constant dense<0.000000e+00> : vector<6x32xf32>
    %217 = tpu.matmul %214, %216, %cst_149 {dimension_numbers = #tpu.dot_dimension_numbers<[1], [0], [0], [1], [0, 0, 1, 1], [], []>} : vector<6x24xf32>, vector<24x32xf32>, vector<6x32xf32> -> vector<6x32xf32>
    %218 = arith.addf %213, %217 : vector<6x32xf32>
    %c8 = arith.constant 8 : index
    %c0_150 = arith.constant 0 : index
    %219 = vector.load %arg18[%c8, %c0_150] : memref<14x24xf32, #tpu.memory_space<vmem>>, vector<6x24xf32>
    %c1_151 = arith.constant 1 : index
    %c0_152 = arith.constant 0 : index
    %c0_153 = arith.constant 0 : index
    %220 = vector.load %arg10[%c1_151, %c0_152, %c0_153] : memref<2x24x32xf32, #tpu.memory_space<vmem>>, vector<1x24x32xf32>
    %221 = vector.shape_cast %220 : vector<1x24x32xf32> to vector<24x32xf32>
    %cst_154 = arith.constant dense<0.000000e+00> : vector<6x32xf32>
    %222 = tpu.matmul %219, %221, %cst_154 {dimension_numbers = #tpu.dot_dimension_numbers<[1], [0], [0], [1], [0, 0, 1, 1], [], []>} : vector<6x24xf32>, vector<24x32xf32>, vector<6x32xf32> -> vector<6x32xf32>
    %223 = arith.addf %218, %222 : vector<6x32xf32>
    %c0_155 = arith.constant 0 : index
    %c0_156 = arith.constant 0 : index
    %224 = vector.load %arg11[%c0_155, %c0_156] : memref<1x32xf32, #tpu.memory_space<vmem>>, vector<1x32xf32>
    %225 = vector.broadcast %224 : vector<1x32xf32> to vector<6x32xf32>
    %226 = arith.addf %223, %225 : vector<6x32xf32>
    %cst_157 = arith.constant dense<0.000000e+00> : vector<32xf32>
    %227 = vector.multi_reduction <add>, %226, %cst_157 [0] : vector<6x32xf32> to vector<32xf32>
    %228 = vector.shape_cast %227 : vector<32xf32> to vector<1x32xf32>
    %229 = arith.addf %212, %228 : vector<1x32xf32>
    %cst_158 = arith.constant 0.0833333358 : f32
    %230 = vector.broadcast %cst_158 : f32 to vector<1x32xf32>
    %231 = arith.mulf %229, %230 : vector<1x32xf32>
    %cst_159 = arith.constant 0.000000e+00 : f32
    %232 = vector.broadcast %cst_159 : f32 to vector<1x32xf32>
    %233 = vector.broadcast %231 : vector<1x32xf32> to vector<6x32xf32>
    %234 = arith.subf %209, %233 : vector<6x32xf32>
    %235 = arith.mulf %234, %234 : vector<6x32xf32>
    %cst_160 = arith.constant dense<0.000000e+00> : vector<32xf32>
    %236 = vector.multi_reduction <add>, %235, %cst_160 [0] : vector<6x32xf32> to vector<32xf32>
    %237 = vector.shape_cast %236 : vector<32xf32> to vector<1x32xf32>
    %238 = arith.addf %232, %237 : vector<1x32xf32>
    %239 = vector.broadcast %231 : vector<1x32xf32> to vector<6x32xf32>
    %240 = arith.subf %226, %239 : vector<6x32xf32>
    %241 = arith.mulf %240, %240 : vector<6x32xf32>
    %cst_161 = arith.constant dense<0.000000e+00> : vector<32xf32>
    %242 = vector.multi_reduction <add>, %241, %cst_161 [0] : vector<6x32xf32> to vector<32xf32>
    %243 = vector.shape_cast %242 : vector<32xf32> to vector<1x32xf32>
    %244 = arith.addf %238, %243 : vector<1x32xf32>
    %cst_162 = arith.constant 0.0833333358 : f32
    %245 = vector.broadcast %cst_162 : f32 to vector<1x32xf32>
    %246 = arith.mulf %244, %245 : vector<1x32xf32>
    %c0_163 = arith.constant 0 : index
    %c0_164 = arith.constant 0 : index
    %247 = vector.load %arg12[%c0_163, %c0_164] : memref<1x32xf32, #tpu.memory_space<vmem>>, vector<1x32xf32>
    %cst_165 = arith.constant 9.99999974E-6 : f32
    %248 = vector.broadcast %cst_165 : f32 to vector<1x32xf32>
    %249 = arith.addf %246, %248 : vector<1x32xf32>
    %250 = math.rsqrt %249 : vector<1x32xf32>
    %251 = arith.mulf %247, %250 : vector<1x32xf32>
    %c0_166 = arith.constant 0 : index
    %c0_167 = arith.constant 0 : index
    %252 = vector.load %arg13[%c0_166, %c0_167] : memref<1x32xf32, #tpu.memory_space<vmem>>, vector<1x32xf32>
    %253 = arith.mulf %231, %251 : vector<1x32xf32>
    %254 = arith.subf %252, %253 : vector<1x32xf32>
    %255 = vector.broadcast %251 : vector<1x32xf32> to vector<6x32xf32>
    %256 = arith.mulf %209, %255 : vector<6x32xf32>
    %257 = vector.broadcast %254 : vector<1x32xf32> to vector<6x32xf32>
    %258 = arith.addf %256, %257 : vector<6x32xf32>
    %259 = tpu.transpose %258, [1, 0] : vector<6x32xf32> -> vector<32x6xf32>
    %c0_168 = arith.constant 0 : index
    %c0_169 = arith.constant 0 : index
    %c0_170 = arith.constant 0 : index
    %260 = vector.load %arg14[%c0_168, %c0_169, %c0_170] : memref<2x32x6xf32, #tpu.memory_space<vmem>>, vector<1x32x6xf32>
    %261 = vector.shape_cast %260 : vector<1x32x6xf32> to vector<32x6xf32>
    %262 = vector.shape_cast %259 : vector<32x6xf32> to vector<1x32x6xf32>
    tpu.vector_store %arg14[%c0_168, %c0_169, %c0_170], %262 {strides = array<i32>} : memref<2x32x6xf32, #tpu.memory_space<vmem>>, vector<1x32x6xf32>,
    %263 = vector.broadcast %251 : vector<1x32xf32> to vector<6x32xf32>
    %264 = arith.mulf %226, %263 : vector<6x32xf32>
    %265 = vector.broadcast %254 : vector<1x32xf32> to vector<6x32xf32>
    %266 = arith.addf %264, %265 : vector<6x32xf32>
    %267 = tpu.transpose %266, [1, 0] : vector<6x32xf32> -> vector<32x6xf32>
    %c1_171 = arith.constant 1 : index
    %c0_172 = arith.constant 0 : index
    %c0_173 = arith.constant 0 : index
    %268 = vector.load %arg14[%c1_171, %c0_172, %c0_173] : memref<2x32x6xf32, #tpu.memory_space<vmem>>, vector<1x32x6xf32>
    %269 = vector.shape_cast %268 : vector<1x32x6xf32> to vector<32x6xf32>
    %270 = vector.shape_cast %267 : vector<32x6xf32> to vector<1x32x6xf32>
    tpu.vector_store %arg14[%c1_171, %c0_172, %c0_173], %270 {strides = array<i32>} : memref<2x32x6xf32, #tpu.memory_space<vmem>>, vector<1x32x6xf32>,
    return
  }
}

</mosaic_0001>

<bundles_post_ra>
// kernel: encoder_cnn_forward.1
= control target key start
LH: loop header
LB: loop body
LE: loop exit
PB: predicated region body
PF: predicated region fallthrough
CT: control target
= control target key end

     0   :  { %vm64_vm0 = vcmask 130048   ;;  %v2465_v7 = vmov 0   ;;  %s2967_s0 = inlined_call_operand.vmem [shape: s32[64,1], index: 0, kind: input, shape index: {}]   ;;  %s2968_s1 = inlined_call_operand.vmem [shape: f32[50,16], index: 1, kind: input, shape index: {}]   ;;  %s2969_s2 = inlined_call_operand.vmem [shape: f32[3,16,16], index: 2, kind: input, shape index: {}]   ;;  %s2970_s3 = inlined_call_operand.vmem [shape: f32[1,16], index: 3, kind: input, shape index: {}]   ;;  %s2971_s4 = inlined_call_operand.vmem [shape: f32[1,16], index: 4, kind: input, shape index: {}]   ;;  %s2972_s5 = inlined_call_operand.vmem [shape: f32[1,16], index: 5, kind: input, shape index: {}]   ;;  %s2973_s6 = inlined_call_operand.vmem [shape: f32[3,16,24], index: 6, kind: input, shape index: {}]   ;;  %s2974_s7 = inlined_call_operand.vmem [shape: f32[1,24], index: 7, kind: input, shape index: {}]   ;;  %s2975_s8 = inlined_call_operand.vmem [shape: f32[1,24], index: 8, kind: input, shape index: {}]   ;;  %s2976_s9 = inlined_call_operand.vmem [shape: f32[1,24], index: 9, kind: input, shape index: {}]   ;;  %s2977_s10 = inlined_call_operand.vmem [shape: f32[2,24,32], index: 10, kind: input, shape index: {}]   ;;  %s2978_s11 = inlined_call_operand.vmem [shape: f32[1,32], index: 11, kind: input, shape index: {}]   ;;  %s2979_s12 = inlined_call_operand.vmem [shape: f32[1,32], index: 12, kind: input, shape index: {}]   ;;  %s2980_s13 = inlined_call_operand.vmem [shape: f32[1,32], index: 13, kind: input, shape index: {}]   ;;  %s2981_s14 = inlined_call_operand.vmem [shape: f32[2,32,6], index: 14, kind: output, shape index: {0}]   ;;  %s2982_s15 = inlined_call_operand.hbm [shape: f32[2,16,32], index: 15, kind: output, shape index: {1}]  }
   0x1   :  { %v2555_v0 = vld [vmem:[%s2968_s1 + $0x10] sm:$0xff]  ;;  %v2560_v1 = vld [vmem:[%s2968_s1] sm:$0xff]  ;;  %v2565_v2 = vld [vmem:[%s2968_s1 + $0x18] sm:$0xff]  ;;  %2405 = vset.pattern.permute.xlu1 %v2465_v7  ;;  %2406 = vset.pattern.permute.xlu0 %v2465_v7 }
   0x2   :  { %v59_v3 = vmul.f32 %v2555_v0, %v2555_v0  ;;  %v57_v4 = vmul.f32 %v2560_v1, %v2560_v1  ;;  %v60_v5 = vmul.f32 %v2565_v2, %v2565_v2  ;;  %v2576_v6 = vld [vmem:[%s2968_s1 + $0x8] sm:$0xff]  ;;  %v2588_v10 = vld [vmem:[%s2968_s1 + $0x20] sm:$0xff] }
   0x3   :  { %v58_v8 = vmul.f32 %v2576_v6, %v2576_v6  ;;  %v2583_v9 = vld [vmem:[%s2968_s1 + $0x28] sm:$0xff]  ;;  %v61_v16 = vmul.f32 %v2588_v10, %v2588_v10 }
   0x4   :  { %v71_v11 = vsel %vm64_vm0, %v59_v3, 0.0  ;;  %v65_v12 = vsel %vm64_vm0, %v57_v4, 0.0  ;;  %v74_v13 = vsel %vm64_vm0, %v60_v5, 0.0  ;;  %v62_v15 = vmul.f32 %v2583_v9, %v2583_v9 }
   0x5   :  { %72 = vadd.xlane.f32.xlu1 %v71_v11  ;;  %66 = vadd.xlane.f32.xlu0 %v65_v12  ;;  %v68_v14 = vsel %vm64_vm0, %v58_v8, 0.0 }
   0x6   :  { %21 = vsyncpa [#allocation6], 0  ;;  %v2601_v17 = vld [vmem:[%s2968_s1 + $0x30] sm:$0x3]  ;;  %v80_v18 = vsel %vm64_vm0, %v62_v15, 0.0  ;;  %v77_v19 = vsel %vm64_vm0, %v61_v16, 0.0  ;;  %v157_v34 = vlaneseq }
   0x7   :  { %v63_v20 = vmul.f32 %v2601_v17, %v2601_v17  ;;  %vm83_vm1 = vcmask 123904   ;;  %v159_v22 = vld [vmem:[%s2967_s0] sm:$0xff]  ;;  %v161_v23 = vld [vmem:[%s2967_s0 + $0x10] sm:$0xff]  ;;  %v162_v24 = vld [vmem:[%s2967_s0 + $0x18] sm:$0xff]  ;;  %vm215_vm3 = vcmask 408576   ;;  %v2466_v50 = vmov 0.0  }
   0x8   :  { %v160_v25 = vld [vmem:[%s2967_s0 + $0x8] sm:$0xff]  ;;  %v163_v26 = vld [vmem:[%s2967_s0 + $0x20] sm:$0xff]  ;;  %v165_v28 = vld [vmem:[%s2967_s0 + $0x30] sm:$0xff]  ;;  %v2635_v37 = vand.u32 127, %v157_v34  ;;  %s2469_s17 = smov [#allocation5]  }
   0x9   :  { %75 = vadd.xlane.f32.xlu1 %v74_v13  ;;  %69 = vadd.xlane.f32.xlu0 %v68_v14  ;;  %v84_v21 = vsel %vm83_vm1, %v63_v20, 0.0  ;;  %v164_v27 = vld [vmem:[%s2967_s0 + $0x28] sm:$0xff]  ;;  %v166_v29 = vld [vmem:[%s2967_s0 + $0x38] sm:$0xff]  ;;  %s2035_s18 = sshll.u32 %s2469_s17, 4  ;;  %s2036_s18 = int_to_ptr.vmem [resolvable:$true] %s2035_s18 }
   0xa   :  { %s2441_s1 = scalar_lea.vmem %s2036_s18, 512  ;;  %p2446_p1 = scmp.lt.s32.totalorder %s2036_s18, %s2036_s18 }
   0xb   :  { %p2442_p0 = scmp.ne.s32.totalorder %s2036_s18, %s2441_s1  ;;  %p2447_p2 = scmp.lt.s32.totalorder %s2441_s1, %s2441_s1 }
   0xd   :  { %81 = vadd.xlane.f32.xlu1 %v80_v18  ;;  %78 = vadd.xlane.f32.xlu0 %v77_v19  ;;  %p2448_p3 = por %p2447_p2, %p2446_p1 }
   0xf   :  { %p2449_p4 = pnand %p2448_p3, %p2442_p0 }
  0x11   :  { %85 = vadd.xlane.f32.xlu0 %v84_v21 }
  0x1e   :  { %168 = vperm.xlu1 %2405, %v159_v22  }
  0x22   :  { %174 = vperm.xlu1 %2405, %v161_v23  }
  0x26   :  { %177 = vperm.xlu1 %2405, %v162_v24  }
  0x27   :  { %171 = vperm.xlu0 %2406, %v160_v25  }
  0x2a   :  { %180 = vperm.xlu1 %2405, %v163_v26  }
  0x2e   :  { %183 = vperm.xlu1 %2405, %v164_v27  }
  0x32   :  { %186 = vperm.xlu1 %2405, %v165_v28  }
  0x36   :  { %189 = vperm.xlu1 %2405, %v166_v29  }
  0x92   :  { %v73_v30 = vpop.xlane.xlu1 %72  ;;  %v67_v31 = vpop.xlane.xlu0 %66 }
  0x93   :  { %2407 = vrsqrt.f32 %v73_v30  ;;  %vm103_vm2 = vcmp.eq.f32.partialorder %v73_v30, inf  ;;  %vm105_vm4 = vcmp.eq.f32.partialorder %v73_v30, 0.0  ;;  %v106_v42 = vand.u32 2147483648, %v73_v30 }
  0x94   :  { %2409 = vrsqrt.f32 %v67_v31  ;;  %vm89_vm5 = vcmp.eq.f32.partialorder %v67_v31, inf  ;;  %v92_v46 = vand.u32 2147483648, %v67_v31  ;;  %vm91_vm7 = vcmp.eq.f32.partialorder %v67_v31, 0.0 }
  0x96   :  { %v76_v32 = vpop.xlane.xlu1 %75  ;;  %v70_v33 = vpop.xlane.xlu0 %69 }
  0x97   :  { %2411 = vrsqrt.f32 %v76_v32  ;;  %vm110_vm8 = vcmp.eq.f32.partialorder %v76_v32, inf  ;;  %vm112_vm9 = vcmp.eq.f32.partialorder %v76_v32, 0.0  ;;  %v113_v57 = vand.u32 2147483648, %v76_v32 }
  0x98   :  { %2413 = vrsqrt.f32 %v70_v33  ;;  %vm96_vm10 = vcmp.eq.f32.partialorder %v70_v33, inf  ;;  %vm98_vm11 = vcmp.eq.f32.partialorder %v70_v33, 0.0  ;;  %v99_v60 = vand.u32 2147483648, %v70_v33 }
  0x9a   :  { %v82_v35 = vpop.xlane.xlu1 %81  ;;  %v2631_v36 = vpop.xlane.xlu0 %78 }
  0x9b   :  { %2415 = vrsqrt.f32 %v82_v35  ;;  %vm124_vm12 = vcmp.eq.f32.partialorder %v82_v35, inf  ;;  %vm126_vm13 = vcmp.eq.f32.partialorder %v82_v35, 0.0  ;;  %v127_v11 = vand.u32 2147483648, %v82_v35 }
  0x9c   :  { %2417 = vrsqrt.f32 %v2631_v36  ;;  %vm117_vm14 = vcmp.eq.f32.partialorder %v2631_v36, inf  ;;  %v120_v14 = vand.u32 2147483648, %v2631_v36  ;;  %vm119_vm15 = vcmp.eq.f32.partialorder %v2631_v36, 0.0 }
  0x9d   :  { %v2408_v38 = vpop.eup %2407 }
  0x9e   :  { %v2410_v39 = vpop.eup %2409  ;;  %v102_v40 = vmul.f32 %v2408_v38, %v73_v30  ;;  %v2637_v41 = vpop.xlane.xlu0 %85 }
  0x9f   :  { %v88_v43 = vmul.f32 %v2410_v39, %v67_v31  ;;  %2419 = vrsqrt.f32 %v2637_v41  ;;  %v169_v44 = vpop.permute.xlu1 %168  ;;  %vm131_vm1 = vcmp.eq.f32.partialorder %v2637_v41, inf  ;;  %v134_v23 = vand.u32 2147483648, %v2637_v41 }
  0xa0   :  { %v104_v45 = vsel %vm103_vm2, %v73_v30, %v102_v40  ;;  %vm191_vm6 = vcmp.eq.s32.totalorder %v169_v44, %v2635_v37  ;;  %vm133_vm2 = vcmp.eq.f32.partialorder %v2637_v41, 0.0 }
  0xa1   :  { %v2412_v47 = vpop.eup %2411  ;;  %v107_v48 = vsel %vm105_vm4, %v106_v42, %v104_v45  ;;  %v90_v49 = vsel %vm89_vm5, %v67_v31, %v88_v43  ;;  %v2048_v51 = vsel %vm191_vm6, 1.0, %v2466_v50  ;;  %vm240_vm4 = vcmask 1041408  }
  0xa2   :  { %v2414_v52 = vpop.eup %2413  ;;  %v138_v53 = vmax.f32 %v107_v48, 1e-12  ;;  %v93_v54 = vsel %vm91_vm7, %v92_v46, %v90_v49  ;;  %v109_v55 = vmul.f32 %v2412_v47, %v76_v32  ;;  %2192 = vmatprep.mubr.msk.f32.mxu0 %vm215_vm3, %v2048_v51 }
  0xa3   :  { %v136_v56 = vmax.f32 %v93_v54, 1e-12  ;;  %v95_v58 = vmul.f32 %v2414_v52, %v70_v33  ;;  %v175_v26 = vpop.permute.xlu1 %174  ;;  %v2065_v54 = vld [vmem:[%s2969_s2 + $0x10] sm:$0xff] }
  0xa4   :  { %v111_v59 = vsel %vm110_vm8, %v76_v32, %v109_v55  ;;  %2421 = vrcp.f32 %v138_v53  ;;  %vm193_vm6 = vcmp.eq.s32.totalorder %v175_v26, %v2635_v37  ;;  %v2066_v55 = vld [vmem:[%s2969_s2 + $0x18] sm:$0xff]  ;;  %v1047_v26 = vld [vmem:[%s2973_s6 + $0x8] sm:$0xff] }
  0xa5   :  { %v2416_v61 = vpop.eup %2415  ;;  %v114_v62 = vsel %vm112_vm9, %v113_v57, %v111_v59  ;;  %v97_v63 = vsel %vm96_vm10, %v70_v33, %v95_v58  ;;  %2423 = vrcp.f32 %v136_v56  ;;  %v2336_v56 = vpack.c.bf16 %v2066_v55, %v2065_v54  ;;  %v431_v57 = vld [vmem:[%s2969_s2 + $0x8] sm:$0xff] }
  0xa6   :  { %v2418_v3 = vpop.eup %2417  ;;  %v139_v4 = vmax.f32 %v114_v62, 1e-12  ;;  %v100_v5 = vsel %vm98_vm11, %v99_v60, %v97_v63  ;;  %v123_v7 = vmul.f32 %v2416_v61, %v82_v35 }
  0xa7   :  { %v137_v8 = vmax.f32 %v100_v5, 1e-12  ;;  %v116_v12 = vmul.f32 %v2418_v3, %v2631_v36  ;;  %v178_v32 = vpop.permute.xlu1 %177  ;;  %2337 = vmatprep.subr.bf16.mxu1 %v2336_v56  ;;  %v2071_v5 = vld [vmem:[%s2969_s2 + $0x20] sm:$0xff] }
  0xa8   :  { %2425 = vrcp.f32 %v139_v4  ;;  %v125_v13 = vsel %vm124_vm12, %v82_v35, %v123_v7  ;;  %vm194_vm7 = vcmp.eq.s32.totalorder %v178_v32, %v2635_v37  ;;  %2339 = vmatpush3.bf16.msra.mxu1 %v2336_v56  ;;  %v2072_v7 = vld [vmem:[%s2969_s2 + $0x28] sm:$0xff]  ;;  %v2075_v32 = vld [vmem:[%s2970_s3] ss:$0 sm:$0xff]  ;;  %vm701_vm12 = vcmask 129024  }
  0xa9   :  { %v2420_v15 = vpop.eup %2419  ;;  %v128_v16 = vsel %vm126_vm13, %v127_v11, %v125_v13  ;;  %v118_v18 = vsel %vm117_vm14, %v2631_v36, %v116_v12  ;;  %2427 = vrcp.f32 %v137_v8  ;;  %v2344_v11 = vpack.c.bf16 %v2072_v7, %v2071_v5 }
  0xaa   :  { %v141_v19 = vmax.f32 %v128_v16, 1e-12  ;;  %v121_v20 = vsel %vm119_vm15, %v120_v14, %v118_v18  ;;  %v130_v21 = vmul.f32 %v2420_v15, %v2637_v41  ;;  %vm1588_vm13 = vcmask 195584  }
  0xab   :  { %v140_v22 = vmax.f32 %v121_v20, 1e-12  ;;  %v181_v45 = vpop.permute.xlu1 %180  ;;  %vm1743_vm14 = vcmask 259072   ;;  %vm1984_vm15 = vcmask 48128  }
  0xac   :  { %2429 = vrcp.f32 %v141_v19  ;;  %v132_v24 = vsel %vm131_vm1, %v2637_v41, %v130_v21  ;;  %vm195_vm8 = vcmp.eq.s32.totalorder %v181_v45, %v2635_v37  ;;  %vm389_vm1 = vcmask 261120  }
  0xad   :  { %2431 = vrcp.f32 %v140_v22  ;;  %v135_v25 = vsel %vm133_vm2, %v134_v23, %v132_v24  ;;  %v2052_v48 = vsel %vm195_vm8, 1.0, %v2466_v50 }
  0xae   :  { %v142_v27 = vmax.f32 %v135_v25, 1e-12  ;;  %v2422_v28 = vpop.eup %2421  ;;  %v1046_v25 = vld [vmem:[%s2973_s6] sm:$0xff] }
  0xaf   :  { %v2424_v29 = vpop.eup %2423  ;;  %v148_v40 = vmul.f32 %v2422_v28, %v2555_v0  ;;  %v2467_v28 = vmov 0.0|0.0  }
  0xb0   :  { %2433 = vrcp.f32 %v142_v27  ;;  %v144_v33 = vmul.f32 %v2424_v29, %v2560_v1  ;;  %v2082_v27 = vld [vmem:[%s2973_s6 + $0x10] sm:$0xff]  ;;  %v2753_v29 = vpack.c.bf16 %v1047_v26, %v1046_v25 }
  0xb2   :  { %v2426_v30 = vpop.eup %2425 }
  0xb3   :  { %v2428_v31 = vpop.eup %2427  ;;  %v150_v36 = vmul.f32 %v2426_v30, %v2565_v2  ;;  %v184_v2 = vpop.permute.xlu1 %183  ;;  %v2083_v30 = vld [vmem:[%s2973_s6 + $0x18] sm:$0xff] }
  0xb4   :  { %v146_v35 = vmul.f32 %v2428_v31, %v2576_v6  ;;  %v172_v6 = vpop.permute.xlu0 %171  ;;  %vm196_vm9 = vcmp.eq.s32.totalorder %v184_v2, %v2635_v37  ;;  %v2759_v31 = vpack.c.bf16 %v2083_v30, %v2082_v27 }
  0xb5   :  { %v2328_v42 = vpack.c.bf16 %v150_v36, %v148_v40  ;;  %vm192_vm5 = vcmp.eq.s32.totalorder %v172_v6, %v2635_v37  ;;  %v2053_v51 = vsel %vm196_vm9, 1.0, %v2466_v50 }
  0xb6   :  { %v2430_v38 = vpop.eup %2429  ;;  %v2324_v39 = vpack.c.bf16 %v146_v35, %v144_v33  ;;  %v2049_v0 = vsel %vm192_vm5, 1.0, %v2466_v50 }
  0xb7   :  { %v2432_v41 = vpop.eup %2431  ;;  %v154_v44 = vmul.f32 %v2430_v38, %v2583_v9  ;;  %v187_v9 = vpop.permute.xlu1 %186 }
  0xb8   :  { %2325 = vmatprep.subr.bf16.mxu0 %v2324_v39  ;;  %v152_v43 = vmul.f32 %v2432_v41, %v2588_v10  ;;  %v2050_v10 = vsel %vm193_vm6, 1.0, %v2466_v50  ;;  %vm197_vm10 = vcmp.eq.s32.totalorder %v187_v9, %v2635_v37 }
  0xb9   :  { %2327 = vmatpush3.bf16.msra.mxu0 %v2324_v39  ;;  %v2054_v52 = vsel %vm197_vm10, 1.0, %v2466_v50 }
  0xba   :  { %2329 = vmatprep.subr.bf16.mxu0 %v2328_v42  ;;  %v2332_v46 = vpack.c.bf16 %v154_v44, %v152_v43  ;;  %v2434_v1 = vpop.eup %2433 }
  0xbb   :  { %v156_v47 = vmul.f32 %v2434_v1, %v2601_v17  ;;  %v2051_v17 = vsel %vm194_vm7, 1.0, %v2466_v50  ;;  %v190_v49 = vpop.permute.xlu1 %189 }
  0xbc   :  { %vm198_vm11 = vcmp.eq.s32.totalorder %v190_v49, %v2635_v37  ;;  %v430_v37 = vld [vmem:[%s2969_s2] sm:$0xff] }
  0xbd   :  { %2331 = vmatpush3.bf16.msra.mxu0 %v2328_v42  ;;  %v2055_v53 = vsel %vm198_vm11, 1.0, %v2466_v50  ;;  %v2340_v58 = vpack.c.bf16 %v431_v57, %v430_v37 }
  0xbe   :  { %2333 = vmatprep.subr.bf16.mxu0 %v2332_v46 }
  0xbf   :  { %2341 = vmatprep.subr.bf16.mxu1 %v2340_v58 }
  0xc1   :  { %2335 = vmatpush3.bf16.msra.mxu0 %v2332_v46 }
  0xc2   :  { %2190 = vmatprep.subr.msk.mxu0 %vm240_vm4, %v156_v47 }
  0xc5   :  { %2191 = vmatpush3.msk.msra.mxu0 %vm240_vm4, %v156_v47 }
  0xc6   :  { %2193 = vmatmul.mubr.msk.f32.vlgmr.msra.gmra.mrb[0].mxu0 %vm215_vm3, %v2049_v0  ;;  %2363 = vmatprep.subr.bf16.mxu0 %v2467_v28 }
  0xc7   :  { %2195 = vmatprep.mubr.msk.f32.mxu0 %vm215_vm3, %v2050_v10  ;;  %2365 = vmatpush3.bf16.msra.mxu0 %v2753_v29 }
  0xc8   :  { %2369 = vmatprep.subr.bf16.mxu0 %v2467_v28 }
  0xca   :  { %2196 = vmatmul.mubr.msk.f32.gmra.mrb[2].mxu0 %vm215_vm3, %v2051_v17 }
  0xcb   :  { %2198 = vmatprep.mubr.msk.f32.mxu0 %vm215_vm3, %v2052_v48 }
  0xce   :  { %2199 = vmatmul.mubr.msk.f32.gmra.mrb[4].mxu0 %vm215_vm3, %v2053_v51 }
  0xcf   :  { %2201 = vmatprep.mubr.msk.f32.mxu0 %vm215_vm3, %v2054_v52 }
  0xd2   :  { %2202 = vmatmul.mubr.msk.f32.gmra.mrb[6].mxu0 %vm215_vm3, %v2055_v53  ;;  %vm2468_vm3 = vmmov 0  }
  0xd3   :  { %2257 = vmatprep.mubr.msk.f32.mxu0 %vm2468_vm3, %v2466_v50 }
 0x199   :  { %v2693_v59 = vpop.f32.mrb[0].mxu0 }
 0x19a   :  { %350 = vst.msk [vmem:[#allocation2 + $0x8] sm:$0xff] %vm64_vm0, %v2693_v59  ;;  %v2697_v60 = vpop.f32.mrb[1].mxu0 }
 0x19b   :  { %349 = vst.msk [vmem:[#allocation2] sm:$0xff] %vm64_vm0, %v2697_v60 }
 0x19d   :  { %v2701_v61 = vpop.f32.mrb[2].mxu0 }
 0x19e   :  { %352 = vst.msk [vmem:[#allocation2 + $0x18] sm:$0xff] %vm64_vm0, %v2701_v61  ;;  %v2705_v62 = vpop.f32.mrb[3].mxu0 }
 0x19f   :  { %351 = vst.msk [vmem:[#allocation2 + $0x10] sm:$0xff] %vm64_vm0, %v2705_v62 }
 0x1a1   :  { %v2709_v63 = vpop.f32.mrb[4].mxu0 }
 0x1a2   :  { %354 = vst.msk [vmem:[#allocation2 + $0x28] sm:$0xff] %vm64_vm0, %v2709_v63  ;;  %v2713_v3 = vpop.f32.mrb[5].mxu0  ;;  %v433_v4 = vld [vmem:[#allocation2 + $0x1] ss:$2 sm:$0xff]  ;;  %v427_v14 = vld [vmem:[#allocation2] ss:$2 sm:$0xff] }
 0x1a3   :  { %353 = vst.msk [vmem:[#allocation2 + $0x20] sm:$0xff] %vm64_vm0, %v2713_v3  ;;  %2208 = vmatprep.mubr.msk.f32.mxu1 %vm64_vm0, %v433_v4 }
 0x1a5   :  { %v2724_v8 = vpop.f32.mrb[6].mxu0 }
 0x1a6   :  { %356 = vst.msk [vmem:[#allocation2 + $0x38] sm:$0xff] %vm64_vm0, %v2724_v8  ;;  %v2728_v12 = vpop.f32.mrb[7].mxu0  ;;  %v435_v13 = vld [vmem:[#allocation2 + $0x11] ss:$2 sm:$0x7f] }
 0x1a7   :  { %355 = vst.msk [vmem:[#allocation2 + $0x30] sm:$0xff] %vm64_vm0, %v2728_v12  ;;  %2209 = vmatmul.mubr.msk.f32.vlgmr.msra.gmra.mrb[0].mxu1 %vm64_vm0, %v435_v13  ;;  %v429_v15 = vld [vmem:[#allocation2 + $0x10] ss:$2 sm:$0x7f] }
 0x1a8   :  { %2343 = vmatpush3.bf16.msra.mxu1 %v2340_v58  ;;  %2215 = vmatprep.mubr.msk.f32.mxu1 %vm64_vm0, %v427_v14  ;;  %v602_v16 = vld [vmem:[#allocation2 + $0x2] ss:$2 sm:$0xff]  ;;  %v604_v18 = vld [vmem:[#allocation2 + $0x12] ss:$2 sm:$0x7f] }
 0x1a9   :  { %2345 = vmatprep.subr.bf16.mxu1 %v2344_v11 }
 0x1aa   :  { %v716_v19 = vld [vmem:[#allocation2 + $0x21] ss:$2 sm:$0xff]  ;;  %v712_v21 = vld [vmem:[#allocation2 + $0x20] ss:$2 sm:$0xff] }
 0x1ae   :  { %v718_v20 = vld [vmem:[#allocation2 + $0x31] ss:$2 sm:$0x7f]  ;;  %v714_v22 = vld [vmem:[#allocation2 + $0x30] ss:$2 sm:$0x7f] }
 0x1af   :  { %2216 = vmatmul.mubr.msk.f32.vlgmr.msra.gmra.mrb[0].mxu1 %vm64_vm0, %v429_v15  ;;  %v882_v23 = vld [vmem:[#allocation2 + $0x22] ss:$2 sm:$0xff]  ;;  %v884_v24 = vld [vmem:[#allocation2 + $0x32] ss:$2 sm:$0x7f] }
 0x1b0   :  { %2347 = vmatpush3.bf16.msra.mxu1 %v2344_v11  ;;  %2222 = vmatprep.mubr.msk.f32.mxu1 %vm64_vm0, %v602_v16 }
 0x1b1   :  { %2349 = vmatprep.subr.bf16.mxu1 %v2336_v56 }
 0x1b7   :  { %2223 = vmatmul.mubr.msk.f32.vlgmr.msra.gmra.mrb[0].mxu1 %vm64_vm0, %v604_v18 }
 0x1b8   :  { %2351 = vmatpush3.bf16.msra.mxu1 %v2336_v56  ;;  %2229 = vmatprep.mubr.msk.f32.mxu1 %vm64_vm0, %v716_v19 }
 0x1b9   :  { %2353 = vmatprep.subr.bf16.mxu1 %v2340_v58 }
 0x1bb   :  { %2230 = vmatmul.mubr.msk.f32.vlgmr.msra.gmra.mrb[2].mxu1 %vm64_vm0, %v718_v20 }
 0x1bc   :  { %2355 = vmatpush3.bf16.msra.mxu1 %v2340_v58  ;;  %2236 = vmatprep.mubr.msk.f32.mxu1 %vm64_vm0, %v712_v21 }
 0x1bd   :  { %2357 = vmatprep.subr.bf16.mxu1 %v2344_v11 }
 0x1c3   :  { %2237 = vmatmul.mubr.msk.f32.vlgmr.msra.gmra.mrb[2].mxu1 %vm64_vm0, %v714_v22 }
 0x1c4   :  { %2359 = vmatpush3.bf16.msra.mxu1 %v2344_v11  ;;  %2243 = vmatprep.mubr.msk.f32.mxu1 %vm64_vm0, %v882_v23 }
 0x1c5   :  { %2360 = vmatprep.subr.bf16.mxu1 %v2467_v28 }
 0x1cb   :  { %2244 = vmatmul.mubr.msk.f32.vlgmr.msra.gmra.mrb[2].mxu1 %vm64_vm0, %v884_v24 }
 0x1cc   :  { %2250 = vmatprep.mubr.msk.f32.mxu1 %vm2468_vm3, %v2466_v50  ;;  %2362 = vmatpush3.bf16.msra.mxu1 %v2759_v31 }
 0x1cd   :  { %2366 = vmatprep.subr.bf16.mxu1 %v2467_v28 }
 0x28a   :  { %v2224_v33 = vpop.f32.mrb[0].mxu1 }
 0x28b   :  { %v2772_v35 = vadd.f32 %v2224_v33, %v2075_v32  ;;  %v680_v36 = vpop.f32.mrb[1].mxu1 }
 0x28c   :  { %v2774_v38 = vadd.f32 %v2075_v32, %v680_v36 }
 0x28d   :  { %v702_v39 = vsel %vm701_vm12, %v2772_v35, 0.0 }
 0x28e   :  { %v700_v40 = vsel %vm64_vm0, %v2774_v38, 0.0 }
 0x28f   :  { %v703_v41 = vadd.f32 %v702_v39, %v700_v40 }
 0x291   :  { %v704_v42 = vrot.slane %v703_v41, 4 }
 0x293   :  { %v705_v44 = vadd.f32 %v704_v42, %v703_v41 }
 0x295   :  { %v706_v47 = vrot.slane %v705_v44, 2 }
 0x297   :  { %v707_v10 = vadd.f32 %v706_v47, %v705_v44  ;;  %v1010_v44 = vld [vmem:[%s2971_s4] sm:$0x1] }
 0x298   :  { %v1014_v47 = vld [vmem:[%s2972_s5] sm:$0x1] }
 0x299   :  { %v708_v49 = vrot.slane %v707_v10, 1 }
 0x29b   :  { %v709_v53 = vadd.f32 %v708_v49, %v707_v10 }
 0x29e   :  { %v2245_v43 = vpop.f32.mrb[2].mxu1 }
 0x29f   :  { %v969_v45 = vadd.f32 %v2245_v43, %v2075_v32  ;;  %v957_v46 = vpop.f32.mrb[3].mxu1  ;;  %v1019_v43 = vshrl.u32 %v157_v34, 7 }
 0x2a0   :  { %v968_v1 = vadd.f32 %v2075_v32, %v957_v46 }
 0x2a1   :  { %v971_v6 = vsel %vm701_vm12, %v969_v45, 0.0  ;;  %v2792_v46 = vsub.s32 0, %v1019_v43 }
 0x2a2   :  { %v970_v2 = vsel %vm64_vm0, %v968_v1, 0.0 }
 0x2a3   :  { %v972_v0 = vadd.f32 %v971_v6, %v970_v2 }
 0x2a5   :  { %v973_v9 = vrot.slane %v972_v0, 4 }
 0x2a7   :  { %v974_v17 = vadd.f32 %v973_v9, %v972_v0 }
 0x2a9   :  { %v975_v48 = vrot.slane %v974_v17, 2 }
 0x2ab   :  { %v976_v51 = vadd.f32 %v975_v48, %v974_v17 }
 0x2ad   :  { %v977_v52 = vrot.slane %v976_v51, 1 }
 0x2af   :  { %v978_v54 = vadd.f32 %v977_v52, %v976_v51 }
 0x2b1   :  { %v979_v55 = vadd.f32 %v978_v54, %v709_v53 }
 0x2b3   :  { %v980_v56 = vmul.f32 0.033333335, %v979_v55 }
 0x2b5   :  { %v981_v37 = vsub.f32 %v2774_v38, %v980_v56  ;;  %v982_v57 = vsub.f32 %v2772_v35, %v980_v56  ;;  %v995_v58 = vsub.f32 %v968_v1, %v980_v56  ;;  %v996_v4 = vsub.f32 %v969_v45, %v980_v56 }
 0x2b7   :  { %v983_v5 = vmul.f32 %v981_v37, %v981_v37  ;;  %v984_v7 = vmul.f32 %v982_v57, %v982_v57  ;;  %v997_v11 = vmul.f32 %v995_v58, %v995_v58  ;;  %v998_v13 = vmul.f32 %v996_v4, %v996_v4 }
 0x2b9   :  { %v985_v14 = vsel %vm64_vm0, %v983_v5, 0.0  ;;  %v986_v15 = vsel %vm701_vm12, %v984_v7, 0.0  ;;  %v999_v16 = vsel %vm64_vm0, %v997_v11, 0.0  ;;  %v1000_v18 = vsel %vm701_vm12, %v998_v13, 0.0  ;;  %v2094_v13 = vld [vmem:[%s2977_s10 + $0x20] sm:$0xff] }
 0x2ba   :  { %v987_v19 = vadd.f32 %v986_v15, %v985_v14  ;;  %v1001_v20 = vadd.f32 %v1000_v18, %v999_v16  ;;  %v1580_v14 = vld [vmem:[%s2977_s10] sm:$0xff]  ;;  %v1581_v16 = vld [vmem:[%s2977_s10 + $0x8] sm:$0xff] }
 0x2bb   :  { %v2849_v18 = vpack.c.bf16 %v1581_v16, %v1580_v14 }
 0x2bc   :  { %v988_v21 = vrot.slane %v987_v19, 4  ;;  %v1002_v22 = vrot.slane %v1001_v20, 4 }
 0x2be   :  { %v989_v23 = vadd.f32 %v988_v21, %v987_v19  ;;  %v1003_v24 = vadd.f32 %v1002_v22, %v1001_v20  ;;  %v2857_v19 = vld [vmem:[%s2977_s10 + $0x28] sm:$0xff]  ;;  %v2863_v20 = vld [vmem:[%s2977_s10 + $0x10] sm:$0xff] }
 0x2c0   :  { %v990_v25 = vrot.slane %v989_v23, 2  ;;  %v1004_v26 = vrot.slane %v1003_v24, 2 }
 0x2c2   :  { %v991_v27 = vadd.f32 %v990_v25, %v989_v23  ;;  %v1005_v30 = vadd.f32 %v1004_v26, %v1003_v24 }
 0x2c4   :  { %v992_v32 = vrot.slane %v991_v27, 1  ;;  %v1006_v33 = vrot.slane %v1005_v30, 1 }
 0x2c6   :  { %v993_v36 = vadd.f32 %v992_v32, %v991_v27  ;;  %v1007_v39 = vadd.f32 %v1006_v33, %v1005_v30  ;;  %v2089_v27 = vld [vmem:[%s2974_s7] ss:$0 sm:$0xff] }
 0x2c8   :  { %v1008_v40 = vadd.f32 %v1007_v39, %v993_v36 }
 0x2ca   :  { %v1009_v41 = vmul.f32 0.033333335, %v1008_v40 }
 0x2cc   :  { %v1011_v42 = vadd.f32 1e-05, %v1009_v41 }
 0x2ce   :  { %2435 = vrsqrt.f32 %v1011_v42 }
 0x2d8   :  { %v2436_v6 = vpop.eup %2435 }
 0x2d9   :  { %v1013_v2 = vmul.f32 %v2436_v6, %v1010_v44 }
 0x2db   :  { %v1015_v0 = vmul.f32 %v1013_v2, %v980_v56  ;;  %v1021_v9 = vrot.slane %v1013_v2, %v2792_v46 }
 0x2dd   :  { %v1016_v10 = vsub.f32 %v1014_v47, %v1015_v0  ;;  %v1023_v17 = vmul.f32 %v1021_v9, %v2774_v38  ;;  %v1024_v34 = vmul.f32 %v1021_v9, %v2772_v35  ;;  %v1037_v48 = vmul.f32 %v1021_v9, %v968_v1  ;;  %v2086_v35 = vld [vmem:[%s2973_s6 + $0x20] sm:$0xff]  ;;  %v2087_v38 = vld [vmem:[%s2973_s6 + $0x28] sm:$0xff] }
 0x2de   :  { %v1038_v49 = vmul.f32 %v1021_v9, %v969_v45  ;;  %v2367_v45 = vpack.c.bf16 %v2087_v38, %v2086_v35 }
 0x2df   :  { %v1029_v51 = vrot.slane %v1016_v10, %v2792_v46 }
 0x2e1   :  { %v1031_v52 = vadd.f32 %v1029_v51, %v1023_v17  ;;  %v1032_v53 = vadd.f32 %v1029_v51, %v1024_v34  ;;  %v1039_v54 = vadd.f32 %v1037_v48, %v1029_v51  ;;  %v1040_v55 = vadd.f32 %v1038_v49, %v1029_v51 }
 0x2e3   :  { %v1033_v37 = vmax.f32 %v1031_v52, 0.0  ;;  %v1034_v57 = vmax.f32 %v1032_v53, 0.0  ;;  %v1041_v58 = vmax.f32 %v1039_v54, 0.0  ;;  %v1042_v4 = vmax.f32 %v1040_v55, 0.0 }
 0x2e5   :  { %1035 = vst.msk [vmem:[#allocation3] sm:$0xff] %vm64_vm0, %v1033_v37  ;;  %1043 = vst.msk [vmem:[#allocation3 + $0xf] sm:$0xff] %vm64_vm0, %v1041_v58 }
 0x2e6   :  { %1036 = vst.msk [vmem:[#allocation3 + $0x8] sm:$0x7f] %vm701_vm12, %v1034_v57  ;;  %1044 = vst.msk [vmem:[#allocation3 + $0x17] sm:$0x7f] %vm701_vm12, %v1042_v4 }
 0x2ed   :  { %v1049_v1 = vld [vmem:[#allocation3 + $0x1] ss:$2 sm:$0x7f]  ;;  %v1045_v56 = vld [vmem:[#allocation3] ss:$2 sm:$0x7f] }
 0x2ee   :  { %2251 = vmatmul.mubr.msk.f32.vlgmr.msra.gmra.mrb[4].mxu1 %vm64_vm0, %v1049_v1  ;;  %2258 = vmatmul.mubr.msk.f32.vlgmr.msra.gmra.mrb[8].mxu0 %vm64_vm0, %v1045_v56  ;;  %v1200_v5 = vld [vmem:[#allocation3 + $0x2] ss:$2 sm:$0x7f]  ;;  %v1298_v7 = vld [vmem:[#allocation3 + $0x10] ss:$2 sm:$0x7f] }
 0x2ef   :  { %2368 = vmatpush3.bf16.msra.mxu1 %v2367_v45  ;;  %2371 = vmatpush3.bf16.msra.mxu0 %v2759_v31  ;;  %v1296_v31 = vld [vmem:[#allocation3 + $0xf] ss:$2 sm:$0x7f] }
 0x2f0   :  { %2264 = vmatprep.mubr.msk.f32.mxu1 %vm2468_vm3, %v2466_v50  ;;  %2271 = vmatprep.mubr.msk.f32.mxu0 %vm2468_vm3, %v2466_v50  ;;  %v1446_v11 = vld [vmem:[#allocation3 + $0x11] ss:$2 sm:$0x7f] }
 0x2f1   :  { %2372 = vmatprep.subr.bf16.mxu1 %v2467_v28  ;;  %2375 = vmatprep.subr.bf16.mxu0 %v2467_v28 }
 0x2f2   :  { %2265 = vmatmul.mubr.msk.f32.vlgmr.msra.gmra.mrb[6].mxu1 %vm64_vm0, %v1200_v5  ;;  %2272 = vmatmul.mubr.msk.f32.vlgmr.msra.gmra.mrb[10].mxu0 %vm64_vm0, %v1298_v7 }
 0x2f3   :  { %2374 = vmatpush3.bf16.msra.mxu1 %v2753_v29  ;;  %2377 = vmatpush3.bf16.msra.mxu0 %v2367_v45  ;;  %v2093_v29 = vld [vmem:[%s2977_s10 + $0x18] sm:$0xff] }
 0x2f4   :  { %2278 = vmatprep.mubr.msk.f32.mxu1 %vm2468_vm3, %v2466_v50  ;;  %2285 = vmatprep.mubr.msk.f32.mxu0 %vm2468_vm3, %v2466_v50  ;;  %v2844_v15 = vpack.c.bf16 %v2094_v13, %v2093_v29 }
 0x2f5   :  { %2378 = vmatprep.subr.bf16.mxu1 %v2467_v28  ;;  %2381 = vmatprep.subr.bf16.mxu0 %v2467_v28 }
 0x2f6   :  { %2279 = vmatmul.mubr.msk.f32.vlgmr.msra.gmra.mrb[8].mxu1 %vm64_vm0, %v1296_v31  ;;  %2286 = vmatmul.mubr.msk.f32.vlgmr.msra.gmra.mrb[12].mxu0 %vm64_vm0, %v1446_v11  ;;  %vm1286_vm0 = vcmask 194560  }
 0x2f7   :  { %2294 = vmatprep.mubr.msk.f32.mxu1 %vm2468_vm3, %v2466_v50  ;;  %2303 = vmatprep.mubr.msk.f32.mxu0 %vm2468_vm3, %v2466_v50 }
 0x2f8   :  { %2380 = vmatpush3.bf16.msra.mxu1 %v2844_v15  ;;  %2383 = vmatpush3.bf16.msra.mxu0 %v2849_v18 }
 0x2f9   :  { %2292 = vmatprep.subr.mxu1 %v2466_v50  ;;  %2301 = vmatprep.subr.mxu0 %v2466_v50 }
 0x2fc   :  { %2293 = vmatpush3.msra.mxu1 %v2857_v19  ;;  %2302 = vmatpush3.msra.mxu0 %v2863_v20 }
 0x2fd   :  { %2384 = vmatprep.subr.bf16.mxu1 %v2467_v28  ;;  %2387 = vmatprep.subr.bf16.mxu0 %v2467_v28 }
 0x3c1   :  { %v1122_v21 = vpop.f32.mrb[4].mxu1  ;;  %v1195_v22 = vpop.f32.mrb[8].mxu0 }
 0x3c2   :  { %v1196_v23 = vadd.f32 %v1195_v22, %v1122_v21  ;;  %v2252_v24 = vpop.f32.mrb[5].mxu1  ;;  %v2259_v25 = vpop.f32.mrb[9].mxu0 }
 0x3c5   :  { %v1273_v26 = vpop.f32.mrb[6].mxu1  ;;  %v1368_v30 = vpop.f32.mrb[10].mxu0 }
 0x3c6   :  { %v1277_v32 = vadd.f32 %v1273_v26, %v1196_v23  ;;  %v2266_v33 = vpop.f32.mrb[7].mxu1  ;;  %v2273_v36 = vpop.f32.mrb[11].mxu0 }
 0x3c7   :  { %v1556_v33 = vld [vmem:[%s2976_s9] sm:$0x1] }
 0x3c8   :  { %v1285_v39 = vadd.f32 %v2089_v27, %v1277_v32 }
 0x3c9   :  { %v1441_v40 = vpop.f32.mrb[8].mxu1  ;;  %v1516_v41 = vpop.f32.mrb[12].mxu0 }
 0x3ca   :  { %v1287_v28 = vsel %vm1286_vm0, %v1285_v39, 0.0  ;;  %v1442_v42 = vadd.f32 %v1441_v40, %v1368_v30  ;;  %v2280_v43 = vpop.f32.mrb[9].mxu1  ;;  %v2287_v44 = vpop.f32.mrb[13].mxu0 }
 0x3cb   :  { %v1288_v6 = vrot.slane %v1287_v28, 4 }
 0x3cc   :  { %v1520_v2 = vadd.f32 %v1516_v41, %v1442_v42 }
 0x3cd   :  { %v1289_v47 = vadd.f32 %v1288_v6, %v1287_v28 }
 0x3ce   :  { %v1521_v0 = vadd.f32 %v2089_v27, %v1520_v2  ;;  %v1552_v27 = vld [vmem:[%s2975_s8] sm:$0x1] }
 0x3cf   :  { %v1290_v9 = vrot.slane %v1289_v47, 2 }
 0x3d0   :  { %v1522_v10 = vsel %vm1286_vm0, %v1521_v0, 0.0 }
 0x3d1   :  { %v1523_v17 = vrot.slane %v1522_v10, 4  ;;  %v1291_v34 = vadd.f32 %v1290_v9, %v1289_v47 }
 0x3d3   :  { %v1524_v48 = vadd.f32 %v1523_v17, %v1522_v10  ;;  %v1292_v51 = vrot.slane %v1291_v34, 1  ;;  %v2098_v17 = vld [vmem:[%s2978_s11] ss:$0 sm:$0xff] }
 0x3d5   :  { %v1525_v49 = vrot.slane %v1524_v48, 2  ;;  %v1293_v54 = vadd.f32 %v1292_v51, %v1291_v34 }
 0x3d7   :  { %v1526_v52 = vadd.f32 %v1525_v49, %v1524_v48 }
 0x3d9   :  { %v1527_v53 = vrot.slane %v1526_v52, 1 }
 0x3db   :  { %v1528_v55 = vadd.f32 %v1527_v53, %v1526_v52 }
 0x3dd   :  { %v1529_v37 = vadd.f32 %v1528_v55, %v1293_v54 }
 0x3df   :  { %v1530_v57 = vmul.f32 0.071428575, %v1529_v37 }
 0x3e1   :  { %v1531_v58 = vsub.f32 %v1285_v39, %v1530_v57  ;;  %v1541_v4 = vsub.f32 %v1521_v0, %v1530_v57 }
 0x3e3   :  { %v1532_v35 = vmul.f32 %v1531_v58, %v1531_v58  ;;  %v1542_v38 = vmul.f32 %v1541_v4, %v1541_v4 }
 0x3e5   :  { %v1533_v45 = vsel %vm1286_vm0, %v1532_v35, 0.0  ;;  %v1543_v1 = vsel %vm1286_vm0, %v1542_v38, 0.0 }
 0x3e6   :  { %v1534_v56 = vrot.slane %v1533_v45, 4  ;;  %v1544_v5 = vrot.slane %v1543_v1, 4 }
 0x3e8   :  { %v1535_v7 = vadd.f32 %v1534_v56, %v1533_v45  ;;  %v1545_v31 = vadd.f32 %v1544_v5, %v1543_v1 }
 0x3ea   :  { %v1536_v11 = vrot.slane %v1535_v7, 2  ;;  %v1546_v29 = vrot.slane %v1545_v31, 2 }
 0x3ec   :  { %v1537_v13 = vadd.f32 %v1536_v11, %v1535_v7  ;;  %v1547_v14 = vadd.f32 %v1546_v29, %v1545_v31 }
 0x3ee   :  { %v1538_v16 = vrot.slane %v1537_v13, 1  ;;  %v1548_v21 = vrot.slane %v1547_v14, 1 }
 0x3f0   :  { %v1539_v22 = vadd.f32 %v1538_v16, %v1537_v13  ;;  %v1549_v23 = vadd.f32 %v1548_v21, %v1547_v14 }
 0x3f2   :  { %v1550_v24 = vadd.f32 %v1549_v23, %v1539_v22 }
 0x3f4   :  { %v1551_v25 = vmul.f32 0.071428575, %v1550_v24 }
 0x3f6   :  { %v1553_v26 = vadd.f32 1e-05, %v1551_v25 }
 0x3f8   :  { %2437 = vrsqrt.f32 %v1553_v26 }
 0x402   :  { %v2438_v30 = vpop.eup %2437 }
 0x403   :  { %v1555_v32 = vmul.f32 %v2438_v30, %v1552_v27 }
 0x405   :  { %v1557_v36 = vmul.f32 %v1555_v32, %v1530_v57  ;;  %v1563_v40 = vrot.slane %v1555_v32, %v2792_v46 }
 0x407   :  { %v1558_v41 = vsub.f32 %v1556_v33, %v1557_v36  ;;  %v1565_v28 = vmul.f32 %v1563_v40, %v1285_v39  ;;  %v1575_v42 = vmul.f32 %v1563_v40, %v1521_v0 }
 0x409   :  { %v1570_v43 = vrot.slane %v1558_v41, %v2792_v46 }
 0x40b   :  { %v1572_v44 = vadd.f32 %v1570_v43, %v1565_v28  ;;  %v1576_v6 = vadd.f32 %v1575_v42, %v1570_v43 }
 0x40d   :  { %v1573_v2 = vmax.f32 %v1572_v44, 0.0  ;;  %v1577_v47 = vmax.f32 %v1576_v6, 0.0 }
 0x40f   :  { %1574 = vst.msk [vmem:[#allocation4] sm:$0x7f] %vm1286_vm0, %v1573_v2  ;;  %1578 = vst.msk [vmem:[#allocation4 + $0x7] sm:$0x7f] %vm1286_vm0, %v1577_v47  ;;  %v1931_v47 = vld [vmem:[%s2979_s12] sm:$0x1] }
 0x416   :  { %v1583_v9 = vld [vmem:[#allocation4 + $0x1] sm:$0x3f]  ;;  %v1753_v39 = vld [vmem:[#allocation4 + $0x8] sm:$0x3f] }
 0x417   :  { %v1579_v10 = vld [vmem:[#allocation4] sm:$0x3f]  ;;  %2295 = vmatmul.mubr.msk.f32.vlgmr.msra.gmra.mrb[10].mxu1 %vm1588_vm13, %v1583_v9  ;;  %v1752_v0 = vld [vmem:[#allocation4 + $0x7] sm:$0x3f] }
 0x418   :  { %2304 = vmatmul.mubr.msk.f32.vlgmr.msra.gmra.mrb[14].mxu0 %vm1588_vm13, %v1579_v10  ;;  %2386 = vmatpush3.bf16.msra.mxu1 %v2844_v15 }
 0x419   :  { %2389 = vmatpush3.bf16.msra.mxu0 %v2849_v18  ;;  %2310 = vmatprep.subr.mxu1 %v2466_v50 }
 0x41a   :  { %2319 = vmatprep.subr.mxu0 %v2466_v50  ;;  %2312 = vmatprep.mubr.msk.f32.mxu1 %vm2468_vm3, %v2466_v50 }
 0x41b   :  { %2321 = vmatprep.mubr.msk.f32.mxu0 %vm2468_vm3, %v2466_v50 }
 0x41c   :  { %2311 = vmatpush3.msra.mxu1 %v2857_v19 }
 0x41d   :  { %2320 = vmatpush3.msra.mxu0 %v2863_v20  ;;  %2313 = vmatmul.mubr.msk.f32.vlgmr.msra.gmra.mrb[12].mxu1 %vm1588_vm13, %v1753_v39  ;;  %v1935_v39 = vld [vmem:[%s2980_s13] sm:$0x1] }
 0x41e   :  { %2322 = vmatmul.mubr.msk.f32.vlgmr.msra.gmra.mrb[16].mxu0 %vm1588_vm13, %v1752_v0 }
 0x4ea   :  { %v1658_v15 = vpop.f32.mrb[10].mxu1 }
 0x4eb   :  { %v1731_v18 = vpop.f32.mrb[14].mxu0  ;;  %v2296_v48 = vpop.f32.mrb[11].mxu1 }
 0x4ec   :  { %v1732_v34 = vadd.f32 %v1731_v18, %v1658_v15  ;;  %v2305_v49 = vpop.f32.mrb[15].mxu0 }
 0x4ee   :  { %v1742_v50 = vadd.f32 %v2098_v17, %v1732_v34 }
 0x4f0   :  { %v1744_v19 = vsel %vm1743_vm14, %v1742_v50, 0.0  ;;  %v1823_v51 = vpop.f32.mrb[12].mxu1 }
 0x4f1   :  { %v1745_v20 = vrot.slane %v1744_v19, 4  ;;  %v1896_v52 = vpop.f32.mrb[16].mxu0  ;;  %v2314_v54 = vpop.f32.mrb[13].mxu1 }
 0x4f2   :  { %v1897_v53 = vadd.f32 %v1896_v52, %v1823_v51  ;;  %v2323_v55 = vpop.f32.mrb[17].mxu0 }
 0x4f3   :  { %v1746_v37 = vadd.f32 %v1745_v20, %v1744_v19 }
 0x4f4   :  { %v1900_v57 = vadd.f32 %v2098_v17, %v1897_v53 }
 0x4f5   :  { %v1747_v58 = vrot.slane %v1746_v37, 2 }
 0x4f6   :  { %v1901_v4 = vsel %vm1743_vm14, %v1900_v57, 0.0 }
 0x4f7   :  { %v1902_v35 = vrot.slane %v1901_v4, 4  ;;  %v1748_v38 = vadd.f32 %v1747_v58, %v1746_v37 }
 0x4f9   :  { %v1903_v45 = vadd.f32 %v1902_v35, %v1901_v4  ;;  %v1749_v56 = vrot.slane %v1748_v38, 1 }
 0x4fb   :  { %v1904_v1 = vrot.slane %v1903_v45, 2  ;;  %v1750_v31 = vadd.f32 %v1749_v56, %v1748_v38 }
 0x4fd   :  { %v1905_v5 = vadd.f32 %v1904_v1, %v1903_v45 }
 0x4ff   :  { %v1906_v7 = vrot.slane %v1905_v5, 1 }
 0x501   :  { %v1907_v11 = vadd.f32 %v1906_v7, %v1905_v5 }
 0x503   :  { %v1908_v29 = vadd.f32 %v1907_v11, %v1750_v31 }
 0x505   :  { %v1909_v13 = vmul.f32 0.083333336, %v1908_v29 }
 0x507   :  { %v1910_v14 = vsub.f32 %v1742_v50, %v1909_v13  ;;  %v1920_v16 = vsub.f32 %v1900_v57, %v1909_v13 }
 0x509   :  { %v1911_v21 = vmul.f32 %v1910_v14, %v1910_v14  ;;  %v1921_v22 = vmul.f32 %v1920_v16, %v1920_v16 }
 0x50b   :  { %v1912_v23 = vsel %vm1743_vm14, %v1911_v21, 0.0  ;;  %v1922_v24 = vsel %vm1743_vm14, %v1921_v22, 0.0 }
 0x50c   :  { %v1913_v25 = vrot.slane %v1912_v23, 4  ;;  %v1923_v26 = vrot.slane %v1922_v24, 4 }
 0x50e   :  { %v1914_v27 = vadd.f32 %v1913_v25, %v1912_v23  ;;  %v1924_v30 = vadd.f32 %v1923_v26, %v1922_v24 }
 0x510   :  { %v1915_v32 = vrot.slane %v1914_v27, 2  ;;  %v1925_v33 = vrot.slane %v1924_v30, 2 }
 0x512   :  { %v1916_v36 = vadd.f32 %v1915_v32, %v1914_v27  ;;  %v1926_v40 = vadd.f32 %v1925_v33, %v1924_v30 }
 0x514   :  { %v1917_v41 = vrot.slane %v1916_v36, 1  ;;  %v1927_v28 = vrot.slane %v1926_v40, 1 }
 0x516   :  { %v1918_v42 = vadd.f32 %v1917_v41, %v1916_v36  ;;  %v1928_v43 = vadd.f32 %v1927_v28, %v1926_v40 }
 0x518   :  { %v1929_v44 = vadd.f32 %v1928_v43, %v1918_v42 }
 0x51a   :  { %v1930_v6 = vmul.f32 0.083333336, %v1929_v44 }
 0x51c   :  { %v1932_v2 = vadd.f32 1e-05, %v1930_v6 }
 0x51e   :  { %2439 = vrsqrt.f32 %v1932_v2 }
 0x528   :  { %v2440_v9 = vpop.eup %2439 }
 0x529   :  { %v1934_v10 = vmul.f32 %v2440_v9, %v1931_v47 }
 0x52b   :  { %v1936_v0 = vmul.f32 %v1934_v10, %v1909_v13  ;;  %v1942_v15 = vrot.slane %v1934_v10, %v2792_v46 }
 0x52d   :  { %v1937_v18 = vsub.f32 %v1935_v39, %v1936_v0  ;;  %v1989_v17 = vmul.f32 %v1942_v15, %v1900_v57  ;;  %v1944_v34 = vmul.f32 %v1942_v15, %v1742_v50 }
 0x52f   :  { %v1949_v48 = vrot.slane %v1937_v18, %v2792_v46 }
 0x531   :  { %v1990_v49 = vadd.f32 %v1989_v17, %v1949_v48  ;;  %v1951_v19 = vadd.f32 %v1949_v48, %v1944_v34 }
 0x533   :  { %1991 = vxpose.xlu0.b32.start.end [1/1] (short) (narrow) %v1990_v49, 32  ;;  %1952 = vxpose.xlu1.b32.start.end [1/1] (short) (narrow) %v1951_v19, 32 }
 0x540   :  { %357 = vxpose.xlu0.b32.start [1/4] (short) (narrow) %v2697_v60, 16  ;;  %392 = vxpose.xlu1.b32.start [1/4] (short) (narrow) %v2713_v3, 16 }
 0x544   :  { %358 = vxpose.xlu0.b32.cont [2/4] (short) (narrow) %v2693_v59, 16  ;;  %393 = vxpose.xlu1.b32.cont [2/4] (short) (narrow) %v2709_v63, 16 }
 0x548   :  { %359 = vxpose.xlu0.b32.cont [3/4] (short) (narrow) %v2705_v62, 16  ;;  %394 = vxpose.xlu1.b32.cont [3/4] (short) (narrow) %v2728_v12, 16 }
 0x54c   :  { %360 = vxpose.xlu0.b32.end [4/4] (short) (narrow) %v2701_v61, 16  ;;  %395 = vxpose.xlu1.b32.end [4/4] (short) (narrow) %v2724_v8, 16 }
 0x5b3   :  { %v2007_v46 = vpop.trf.xlu0  ;;  %v1968_v50 = vpop.trf.xlu1 }
 0x5b4   :  { %2101 = vst.msk [vmem:[%s2981_s14 + $0x20] sm:$0xff] %vm1984_vm15, %v2007_v46  ;;  %1985 = vst.msk [vmem:[%s2981_s14] sm:$0xff] %vm1984_vm15, %v1968_v50 }
 0x5b7   :  { %v2008_v59 = vpop.trf.xlu0  ;;  %v1969_v60 = vpop.trf.xlu1 }
 0x5b8   :  { %2102 = vst.msk [vmem:[%s2981_s14 + $0x28] sm:$0xff] %vm1984_vm15, %v2008_v59  ;;  %1986 = vst.msk [vmem:[%s2981_s14 + $0x8] sm:$0xff] %vm1984_vm15, %v1969_v60 }
 0x5bb   :  { %v2009_v61 = vpop.trf.xlu0  ;;  %v1970_v62 = vpop.trf.xlu1 }
 0x5bc   :  { %2103 = vst.msk [vmem:[%s2981_s14 + $0x30] sm:$0xff] %vm1984_vm15, %v2009_v61  ;;  %1987 = vst.msk [vmem:[%s2981_s14 + $0x10] sm:$0xff] %vm1984_vm15, %v1970_v62 }
 0x5bf   :  { %v2010_v63 = vpop.trf.xlu0  ;;  %v1971_v3 = vpop.trf.xlu1 }
 0x5c0   :  { %2104 = vst.msk [vmem:[%s2981_s14 + $0x38] sm:$0xff] %vm1984_vm15, %v2010_v63  ;;  %1988 = vst.msk [vmem:[%s2981_s14 + $0x18] sm:$0xff] %vm1984_vm15, %v1971_v3 }
 0x5c3   :  { %v373_v8 = vpop.trf.xlu0  ;;  %v408_v12 = vpop.trf.xlu1 }
 0x5c4   :  { %390 = vst.msk [vmem:[#allocation5] sm:$0xff] %vm389_vm1, %v373_v8  ;;  %425 = vst.msk [vmem:[#allocation5 + $0x10] sm:$0xff] %vm389_vm1, %v408_v12 }
 0x5c7   :  { %v374_v20 = vpop.trf.xlu0  ;;  %v409_v51 = vpop.trf.xlu1 }
 0x5c8   :  { %391 = vst.msk [vmem:[#allocation5 + $0x8] sm:$0xff] %vm389_vm1, %v374_v20  ;;  %426 = vst.msk [vmem:[#allocation5 + $0x18] sm:$0xff] %vm389_vm1, %v409_v51 }
 0x5c9   :  { %2452 = shalt.err (!%p2449_p4)
}
 0x5ca   :  { %s2453_s10 = scalar_lea.hbm %s2982_s15, 512 }
 0x5cb   :  { %p2454_p5 = scmp.ne.s32.totalorder %s2982_s15, %s2453_s10  ;;  %p2457_p6 = scmp.lt.u32.totalorder %s2453_s10, %s2982_s15 }
 0x5cd   :  { %p2459_p7 = pnand %p2457_p6, %p2454_p5 }
 0x5cf   :  { %2462 = shalt.err (!%p2459_p7)
}
 0x5d0   :  { %s2470_s11 = smov 128   ;;  %s2471_s20 = smov 8  }
 0x5d1   :  { %2041 = dma.vmem_to_hbm [thread:$0]  %s2036_s18, 512, %s2982_s15, [#allocation6], %s2470_s11, %s2470_s11, %s2471_s20  }
 0x5d2   :  { %2463 = dma.done.wait [#allocation6], 512  }
 0x5d3   :  { %2464 = vsyncadd [#allocation6], 4294966784 }
 0x5d4   :  { %2047 = vsyncpa [#allocation6], 1 }

</bundles_post_ra>
